<compile_context>
chip_gen: v6e
topology: v6e:2x2x1
jax: 0.10.0
libtpu: 0.0.40
codegen_flags: <defaults>
</compile_context>

<pallas_src>
import numpy as np
import jax
import jax.numpy as jnp
from jax import lax
from jax.experimental import pallas as pl
from jax.experimental.pallas import tpu as pltpu

BN_EPS = 1e-5


def _upsample_matrix(n_in, n_out):
    """1-D interpolation matrix for bilinear upsampling with align_corners=True."""
    A = np.zeros((n_out, n_in), dtype=np.float32)
    if n_in == 1:
        A[:, 0] = 1.0
        return A
    for i in range(n_out):
        src = i * (n_in - 1) / (n_out - 1)
        j0 = min(int(np.floor(src)), n_in - 2)
        frac = src - j0
        A[i, j0] += 1.0 - frac
        A[i, j0 + 1] += frac
    return A


def _shift_matrix(Wo):
    """shift[dw, w_in, w_out] = 1 iff w_in == w_out + dw - 1 (3x3 conv column taps, padding=1)."""
    S = np.zeros((3, Wo, Wo), np.float32)
    for dw in range(3):
        for wo in range(Wo):
            wi = wo + dw - 1
            if 0 <= wi < Wo:
                S[dw, wi, wo] = 1.0
    return S


def _make_kernel(N, Ho, Wo, C1, C2, Cin, Cmid, Cout, kh, kw):
    Mrows = N * Ho

    def kernel(x1_ref, x2_ref, ahblk_ref, rw_ref, b1_ref, b2_ref,
               p1_ref, p2_ref, ssum1_ref, sb1_ref, ssum2_ref, sb2_ref,
               out_ref, comb_pad, mid_pad):
        # ---- halo-only zeroing (conv padding=1 in H): 2 rows per padded slab. ----
        comb_pad[:, 0:1, :] = jnp.zeros((N, 1, Wo * Cin), jnp.float32)
        comb_pad[:, Ho + 1:Ho + 2, :] = jnp.zeros((N, 1, Wo * Cin), jnp.float32)
        mid_pad[:, 0:1, :] = jnp.zeros((N, 1, Wo * Cmid), jnp.float32)
        mid_pad[:, Ho + 1:Ho + 2, :] = jnp.zeros((N, 1, Wo * Cmid), jnp.float32)

        # ---- max_pool2d(x2, kernel=(kh, kw), stride=1): separable, kh + kw maxes. ----
        x2v = x2_ref[...]                                    # (N, H2, W2*C2), lane-packed W*C
        mh = x2v[:, 0:Ho, :]
        for dh in range(1, kh):                              # row (H) pass
            mh = jnp.maximum(mh, x2v[:, dh:dh + Ho, :])
        pooled = mh[:, :, 0:Wo * C2]
        for dw in range(1, kw):                              # column (W) pass on packed lanes
            pooled = jnp.maximum(pooled, mh[:, :, dw * C2:dw * C2 + Wo * C2])

        # ---- bilinear upsample (align_corners=True), separable & batched over N:
        #      exactly 2 matmuls (Rw over packed W*C lanes, block-diagonal Ah over N*H rows). ----
        t = jnp.dot(x1_ref[...], rw_ref[...], preferred_element_type=jnp.float32)   # (N*H1, Wo*C1)
        up = jnp.dot(ahblk_ref[...], t, preferred_element_type=jnp.float32)         # (N*Ho, Wo*C1)

        # ---- one full-width (128-lane) unmasked store of concat([x2_pool, x1_up]). ----
        comb_pad[:, 1:Ho + 1, :] = jnp.concatenate(
            [pooled, up.reshape(N, Ho, Wo * C1)], axis=-1)

        def bn_relu(acc, ssum_ref, sb_ref, p_ref):
            # Training-mode BatchNorm2d + ReLU, fused:
            #   stats  = [row-sum; row-sumsq]  -> one dot with (1/M)-scaled per-channel selector
            #   coeffs = [a_ch; c_ch]          -> one dot back to lane-packed layout
            stats = jnp.concatenate(
                [jnp.sum(acc, axis=0, keepdims=True),
                 jnp.sum(acc * acc, axis=0, keepdims=True)], axis=0)           # (2, Wo*C)
            stats_c = jnp.dot(stats, ssum_ref[...],
                              preferred_element_type=jnp.float32)              # (2, C): [mu; E[x^2]]
            mu = stats_c[0:1, :]
            var = stats_c[1:2, :] - mu * mu
            a_ch = p_ref[0:1, :] * lax.rsqrt(var + BN_EPS)                     # gamma / sqrt(var+eps)
            c_ch = p_ref[1:2, :] - a_ch * mu                                   # beta - a*mu
            coef_ln = jnp.dot(jnp.concatenate([a_ch, c_ch], axis=0), sb_ref[...],
                              preferred_element_type=jnp.float32)              # (2, Wo*C)
            return jnp.maximum(acc * coef_ln[0:1, :] + coef_ln[1:2, :], 0.0)

        # ---- conv1 (3x3, pad=1) on concat([x2_pool, x1_up]): ONE matmul, K = 3*Wo*Cin.
        #      dh taps + channel concat are folded into the banded weight B1. ----
        xrow1 = jnp.concatenate(
            [comb_pad[:, dh:dh + Ho, :].reshape(Mrows, Wo * Cin) for dh in range(3)], axis=1)
        acc1 = jnp.dot(xrow1, b1_ref[...], preferred_element_type=jnp.float32)  # (Mrows, Wo*Cmid)
        mid_pad[:, 1:Ho + 1, :] = bn_relu(acc1, ssum1_ref, sb1_ref,
                                          p1_ref).reshape(N, Ho, Wo * Cmid)

        # ---- conv2 (3x3, pad=1): ONE matmul, K = 3*Wo*Cmid. ----
        xrow2 = jnp.concatenate(
            [mid_pad[:, dh:dh + Ho, :].reshape(Mrows, Wo * Cmid) for dh in range(3)], axis=1)
        acc2 = jnp.dot(xrow2, b2_ref[...], preferred_element_type=jnp.float32)  # (Mrows, Wo*Cout)
        out_ref[...] = bn_relu(acc2, ssum2_ref, sb2_ref, p2_ref)                # (N*Ho, Wo*Cout)

    return kernel


def make_decoder(params, x1_shape, x2_shape):
    """Build a jitted decoder for fixed weights & shapes.

    All banded-weight / selector construction happens HERE (host, once per parameter set);
    the returned callable only does layout transposes + the pallas_call.
    """
    (w1, b1, g1, be1, w2, b2, g2, be2) = params
    del b1, b2  # conv bias is per-channel constant -> cancels exactly under training-mode BN
    N, C1, H1, W1 = x1_shape
    N2, C2, H2, W2 = x2_shape
    assert N == N2
    Ho, Wo = 2 * H1, 2 * W1
    Cin = C1 + C2
    Cmid, Cout = int(w1.shape[0]), int(w2.shape[0])
    assert w1.shape[1] == Cin and w2.shape[1] == Cmid
    kh, kw = H2 - Ho + 1, W2 - Wo + 1
    assert kh >= 1 and kw >= 1, "x2 must be at least as large as the upsampled x1"
    Mrows = N * Ho
    Mtot = float(N * Ho * Wo)

    # ---- host-side, once: separable upsample operators, banded conv weights, BN selectors ----
    w1n = np.asarray(w1, np.float32)
    w2n = np.asarray(w2, np.float32)
    Ah = _upsample_matrix(H1, Ho)                                           # (Ho, H1)
    Ah_blk = jnp.asarray(np.kron(np.eye(N, dtype=np.float32), Ah))          # (N*Ho, N*H1) block-diag
    Aw = _upsample_matrix(W1, Wo)
    # Rw maps lane-packed (q*C1+c) -> (w*C1+c):  Rw[q*C1+c, w*C1+c] = Aw[w, q]
    Rw = jnp.asarray(np.einsum('wq,ce->qcwe', Aw,
                               np.eye(C1, dtype=np.float32)).reshape(W1 * C1, Wo * C1))
    shift = _shift_matrix(Wo)                                               # (3, Wo, Wo)
    # Banded weights: B[dh][w_in*C + c, w_out*Co + o] = W[o, c, dh, w_in - w_out + 1] (0 off-band)
    B1x2 = np.einsum('wxy,ochw->hxcyo', shift, w1n[:, :C2]).reshape(3, Wo * C2, Wo * Cmid)
    B1x1 = np.einsum('wxy,ochw->hxcyo', shift, w1n[:, C2:]).reshape(3, Wo * C1, Wo * Cmid)
    # Channel-concat absorbed along K (x2 lanes then x1 lanes), then dh folded along K too.
    B1 = jnp.asarray(np.concatenate([B1x2, B1x1], axis=1).reshape(3 * Wo * Cin, Wo * Cmid))
    B2 = jnp.asarray(np.einsum('wxy,ochw->hxcyo', shift, w2n).reshape(3 * Wo * Cmid, Wo * Cout))
    # Lane-packed (w*C + c) <-> per-channel selectors; 1/Mtot folded into the reduction selector.
    Ssum1 = jnp.asarray(np.tile(np.eye(Cmid, dtype=np.float32), (Wo, 1)) / Mtot)  # (Wo*Cmid, Cmid)
    Ssum2 = jnp.asarray(np.tile(np.eye(Cout, dtype=np.float32), (Wo, 1)) / Mtot)  # (Wo*Cout, Cout)
    Sb1 = jnp.asarray(np.tile(np.eye(Cmid, dtype=np.float32), (1, Wo)))           # (Cmid, Wo*Cmid)
    Sb2 = jnp.asarray(np.tile(np.eye(Cout, dtype=np.float32), (1, Wo)))           # (Cout, Wo*Cout)
    p1 = jnp.stack([g1, be1], axis=0).astype(jnp.float32)                          # (2, Cmid)
    p2 = jnp.stack([g2, be2], axis=0).astype(jnp.float32)                          # (2, Cout)

    kernel = _make_kernel(N, Ho, Wo, C1, C2, Cin, Cmid, Cout, kh, kw)
    vmem = pl.BlockSpec(memory_space=pltpu.MemorySpace.VMEM)
    # Single-program kernel (no grid): everything fits in VMEM at these sizes.  For large UNet
    # stages, tile Wo / stripe H over a grid ("parallel") and do a two-phase BN reduction.
    pc = pl.pallas_call(
        kernel,
        out_shape=jax.ShapeDtypeStruct((Mrows, Wo * Cout), jnp.float32),   # lane-dense output
        in_specs=[vmem] * 12,
        out_specs=vmem,
        scratch_shapes=[
            pltpu.VMEM((N, Ho + 2, Wo * Cin), jnp.float32),    # concat(x2_pool, x1_up), H-padded
            pltpu.VMEM((N, Ho + 2, Wo * Cmid), jnp.float32),   # mid activations, H-padded
        ],
    )

    @jax.jit
    def run(x1, x2):
        # Lane-packed NHWC slabs: (rows, W*C)
        x1_2d = jnp.transpose(x1, (0, 2, 3, 1)).reshape(N * H1, W1 * C1)
        x2_slab = jnp.transpose(x2, (0, 2, 3, 1)).reshape(N, H2, W2 * C2)
        out2d = pc(x1_2d, x2_slab, Ah_blk, Rw, B1, B2, p1, p2, Ssum1, Sb1, Ssum2, Sb2)
        return jnp.transpose(out2d.reshape(N, Ho, Wo, Cout), (0, 3, 1, 2))  # back to NCHW

    return run


def decoder_ref(x1, x2, params):
    """Pure-JAX reference (same semantics as the PyTorch module) for validation."""
    (w1, b1, g1, be1, w2, b2, g2, be2) = params
    N, C1, H1, W1 = x1.shape
    Ho, Wo = 2 * H1, 2 * W1
    Ah = jnp.asarray(_upsample_matrix(H1, Ho))
    Aw = jnp.asarray(_upsample_matrix(W1, Wo))
    x1u = jnp.einsum('ij,ncjw->nciw', Ah, x1)
    x1u = jnp.einsum('kw,nciw->ncik', Aw, x1u)
    diffH = x2.shape[2] - Ho
    diffW = x2.shape[3] - Wo
    x2p = lax.reduce_window(x2, -jnp.inf, lax.max,
                            (1, 1, diffH + 1, diffW + 1), (1, 1, 1, 1), 'VALID')
    x = jnp.concatenate([x2p, x1u], axis=1)

    def conv_bn_relu(x, w, b, g, be):
        y = lax.conv_general_dilated(x, w, (1, 1), ((1, 1), (1, 1)),
                                     dimension_numbers=('NCHW', 'OIHW', 'NCHW'))
        y = y + b[None, :, None, None]
        mu = jnp.mean(y, axis=(0, 2, 3), keepdims=True)
        var = jnp.mean((y - mu) ** 2, axis=(0, 2, 3), keepdims=True)
        y = g[None, :, None, None] * (y - mu) * lax.rsqrt(var + BN_EPS) + be[None, :, None, None]
        return jnp.maximum(y, 0.0)

    y = conv_bn_relu(x, w1, b1, g1, be1)
    return conv_bn_relu(y, w2, b2, g2, be2)


if __name__ == "__main__":
    # Decoder(in_channels=8, out_channels=8, bilinear=True): x1 has in//2=4 ch, x2 has 4 ch.
    N, C1, H1, W1 = 2, 4, 8, 8
    C2, H2, W2 = 4, 18, 18          # diffH=diffW=2 after upsample -> 3x3 max-pool path exercised
    Cin = C1 + C2                   # 8
    Cout = 8
    Cmid = Cin // 2                 # 4 (bilinear branch of DoubleConv)

    key = jax.random.PRNGKey(0)
    ks = jax.random.split(key, 10)
    w1 = 0.2 * jax.random.normal(ks[0], (Cmid, Cin, 3, 3), jnp.float32)
    b1 = 0.1 * jax.random.normal(ks[1], (Cmid,), jnp.float32)
    g1 = 1.0 + 0.1 * jax.random.normal(ks[2], (Cmid,), jnp.float32)
    be1 = 0.1 * jax.random.normal(ks[3], (Cmid,), jnp.float32)
    w2 = 0.2 * jax.random.normal(ks[4], (Cout, Cmid, 3, 3), jnp.float32)
    b2 = 0.1 * jax.random.normal(ks[5], (Cout,), jnp.float32)
    g2 = 1.0 + 0.1 * jax.random.normal(ks[6], (Cout,), jnp.float32)
    be2 = 0.1 * jax.random.normal(ks[7], (Cout,), jnp.float32)
    params = (w1, b1, g1, be1, w2, b2, g2, be2)

    x1 = jax.random.normal(ks[8], (N, C1, H1, W1), jnp.float32)
    x2 = jax.random.normal(ks[9], (N, C2, H2, W2), jnp.float32)

    decoder = make_decoder(params, x1.shape, x2.shape)   # hoisted host-side prep + jit
    out = jax.block_until_ready(decoder(x1, x2))
    ref = jax.block_until_ready(decoder_ref(x1, x2, params))
    assert out.shape == (N, Cout, 2 * H1, 2 * W1), out.shape
    # 2e-4 tolerance: single-pass (sum / sumsq) batch-norm variance vs. the two-pass reference.
    assert jnp.allclose(out, ref, atol=2e-4, rtol=2e-4), float(jnp.max(jnp.abs(out - ref)))
    print("KERNEL_OK")
</pallas_src>

<mosaic_0001>
module attributes {stable_mosaic.version = 11 : i64} {
  func.func @kernel(%arg0: memref<16x32xf32, #tpu.memory_space<vmem>>, %arg1: memref<2x18x72xf32, #tpu.memory_space<vmem>>, %arg2: memref<32x16xf32, #tpu.memory_space<vmem>>, %arg3: memref<32x64xf32, #tpu.memory_space<vmem>>, %arg4: memref<384x64xf32, #tpu.memory_space<vmem>>, %arg5: memref<192x128xf32, #tpu.memory_space<vmem>>, %arg6: memref<2x4xf32, #tpu.memory_space<vmem>>, %arg7: memref<2x8xf32, #tpu.memory_space<vmem>>, %arg8: memref<64x4xf32, #tpu.memory_space<vmem>>, %arg9: memref<4x64xf32, #tpu.memory_space<vmem>>, %arg10: memref<128x8xf32, #tpu.memory_space<vmem>>, %arg11: memref<8x128xf32, #tpu.memory_space<vmem>>, %arg12: memref<32x128xf32, #tpu.memory_space<vmem>>, %arg13: memref<2x18x128xf32, #tpu.memory_space<vmem>>, %arg14: memref<2x18x64xf32, #tpu.memory_space<vmem>>) attributes {dimension_semantics = [], scalar_prefetch = 0 : i64, scratch_operands = 2 : i64, tpu.core_type = #tpu.core_type<tc>} {
    %cst = arith.constant 0.000000e+00 : f32
    %0 = vector.broadcast %cst : f32 to vector<2x1x128xf32>
    %c0 = arith.constant 0 : index
    %c0_0 = arith.constant 0 : index
    %c0_1 = arith.constant 0 : index
    %1 = vector.load %arg13[%c0, %c0_0, %c0_1] : memref<2x18x128xf32, #tpu.memory_space<vmem>>, vector<2x1x128xf32>
    tpu.vector_store %arg13[%c0, %c0_0, %c0_1], %0 {strides = array<i32>} : memref<2x18x128xf32, #tpu.memory_space<vmem>>, vector<2x1x128xf32>,
    %cst_2 = arith.constant 0.000000e+00 : f32
    %2 = vector.broadcast %cst_2 : f32 to vector<2x1x128xf32>
    %c0_3 = arith.constant 0 : index
    %c17 = arith.constant 17 : index
    %c0_4 = arith.constant 0 : index
    %3 = vector.load %arg13[%c0_3, %c17, %c0_4] : memref<2x18x128xf32, #tpu.memory_space<vmem>>, vector<2x1x128xf32>
    tpu.vector_store %arg13[%c0_3, %c17, %c0_4], %2 {strides = array<i32>} : memref<2x18x128xf32, #tpu.memory_space<vmem>>, vector<2x1x128xf32>,
    %cst_5 = arith.constant 0.000000e+00 : f32
    %4 = vector.broadcast %cst_5 : f32 to vector<2x1x64xf32>
    %c0_6 = arith.constant 0 : index
    %c0_7 = arith.constant 0 : index
    %c0_8 = arith.constant 0 : index
    %5 = vector.load %arg14[%c0_6, %c0_7, %c0_8] : memref<2x18x64xf32, #tpu.memory_space<vmem>>, vector<2x1x64xf32>
    tpu.vector_store %arg14[%c0_6, %c0_7, %c0_8], %4 {strides = array<i32>} : memref<2x18x64xf32, #tpu.memory_space<vmem>>, vector<2x1x64xf32>,
    %cst_9 = arith.constant 0.000000e+00 : f32
    %6 = vector.broadcast %cst_9 : f32 to vector<2x1x64xf32>
    %c0_10 = arith.constant 0 : index
    %c17_11 = arith.constant 17 : index
    %c0_12 = arith.constant 0 : index
    %7 = vector.load %arg14[%c0_10, %c17_11, %c0_12] : memref<2x18x64xf32, #tpu.memory_space<vmem>>, vector<2x1x64xf32>
    tpu.vector_store %arg14[%c0_10, %c17_11, %c0_12], %6 {strides = array<i32>} : memref<2x18x64xf32, #tpu.memory_space<vmem>>, vector<2x1x64xf32>,
    %c0_13 = arith.constant 0 : index
    %c0_14 = arith.constant 0 : index
    %c0_15 = arith.constant 0 : index
    %8 = vector.load %arg1[%c0_13, %c0_14, %c0_15] : memref<2x18x72xf32, #tpu.memory_space<vmem>>, vector<2x18x72xf32>
    %9 = vector.extract_strided_slice %8 {offsets = [0, 0, 0], sizes = [2, 16, 72], strides = [1, 1, 1]} : vector<2x18x72xf32> to vector<2x16x72xf32>
    %10 = vector.extract_strided_slice %8 {offsets = [0, 1, 0], sizes = [2, 16, 72], strides = [1, 1, 1]} : vector<2x18x72xf32> to vector<2x16x72xf32>
    %11 = arith.maximumf %9, %10 : vector<2x16x72xf32>
    %12 = vector.extract_strided_slice %8 {offsets = [0, 2, 0], sizes = [2, 16, 72], strides = [1, 1, 1]} : vector<2x18x72xf32> to vector<2x16x72xf32>
    %13 = arith.maximumf %11, %12 : vector<2x16x72xf32>
    %14 = vector.extract_strided_slice %13 {offsets = [0, 0, 0], sizes = [2, 16, 64], strides = [1, 1, 1]} : vector<2x16x72xf32> to vector<2x16x64xf32>
    %15 = vector.extract_strided_slice %13 {offsets = [0, 0, 4], sizes = [2, 16, 64], strides = [1, 1, 1]} : vector<2x16x72xf32> to vector<2x16x64xf32>
    %16 = arith.maximumf %14, %15 : vector<2x16x64xf32>
    %17 = vector.extract_strided_slice %13 {offsets = [0, 0, 8], sizes = [2, 16, 64], strides = [1, 1, 1]} : vector<2x16x72xf32> to vector<2x16x64xf32>
    %18 = arith.maximumf %16, %17 : vector<2x16x64xf32>
    %c0_16 = arith.constant 0 : index
    %c0_17 = arith.constant 0 : index
    %19 = vector.load %arg0[%c0_16, %c0_17] : memref<16x32xf32, #tpu.memory_space<vmem>>, vector<16x32xf32>
    %c0_18 = arith.constant 0 : index
    %c0_19 = arith.constant 0 : index
    %20 = vector.load %arg3[%c0_18, %c0_19] : memref<32x64xf32, #tpu.memory_space<vmem>>, vector<32x64xf32>
    %cst_20 = arith.constant dense<0.000000e+00> : vector<16x64xf32>
    %21 = tpu.matmul %19, %20, %cst_20 {dimension_numbers = #tpu.dot_dimension_numbers<[1], [0], [0], [1], [0, 0, 1, 1], [], []>} : vector<16x32xf32>, vector<32x64xf32>, vector<16x64xf32> -> vector<16x64xf32>
    %c0_21 = arith.constant 0 : index
    %c0_22 = arith.constant 0 : index
    %22 = vector.load %arg2[%c0_21, %c0_22] : memref<32x16xf32, #tpu.memory_space<vmem>>, vector<32x16xf32>
    %cst_23 = arith.constant dense<0.000000e+00> : vector<32x64xf32>
    %23 = tpu.matmul %22, %21, %cst_23 {dimension_numbers = #tpu.dot_dimension_numbers<[1], [0], [0], [1], [0, 0, 1, 1], [], []>} : vector<32x16xf32>, vector<16x64xf32>, vector<32x64xf32> -> vector<32x64xf32>
    %24 = vector.shape_cast %23 : vector<32x64xf32> to vector<2x16x64xf32>
    %25 = tpu.concatenate %18, %24 in 2 : vector<2x16x64xf32>, vector<2x16x64xf32> -> vector<2x16x128xf32>
    %c0_24 = arith.constant 0 : index
    %c1 = arith.constant 1 : index
    %c0_25 = arith.constant 0 : index
    %26 = vector.load %arg13[%c0_24, %c1, %c0_25] : memref<2x18x128xf32, #tpu.memory_space<vmem>>, vector<2x16x128xf32>
    tpu.vector_store %arg13[%c0_24, %c1, %c0_25], %25 {strides = array<i32>} : memref<2x18x128xf32, #tpu.memory_space<vmem>>, vector<2x16x128xf32>,
    %c0_26 = arith.constant 0 : index
    %c0_27 = arith.constant 0 : index
    %c0_28 = arith.constant 0 : index
    %27 = vector.load %arg13[%c0_26, %c0_27, %c0_28] : memref<2x18x128xf32, #tpu.memory_space<vmem>>, vector<2x16x128xf32>
    %28 = vector.shape_cast %27 : vector<2x16x128xf32> to vector<32x128xf32>
    %c0_29 = arith.constant 0 : index
    %c1_30 = arith.constant 1 : index
    %c0_31 = arith.constant 0 : index
    %29 = vector.load %arg13[%c0_29, %c1_30, %c0_31] : memref<2x18x128xf32, #tpu.memory_space<vmem>>, vector<2x16x128xf32>
    %30 = vector.shape_cast %29 : vector<2x16x128xf32> to vector<32x128xf32>
    %c0_32 = arith.constant 0 : index
    %c2 = arith.constant 2 : index
    %c0_33 = arith.constant 0 : index
    %31 = vector.load %arg13[%c0_32, %c2, %c0_33] : memref<2x18x128xf32, #tpu.memory_space<vmem>>, vector<2x16x128xf32>
    %32 = vector.shape_cast %31 : vector<2x16x128xf32> to vector<32x128xf32>
    %33 = tpu.concatenate %28, %30, %32 in 1 : vector<32x128xf32>, vector<32x128xf32>, vector<32x128xf32> -> vector<32x384xf32>
    %c0_34 = arith.constant 0 : index
    %c0_35 = arith.constant 0 : index
    %34 = vector.load %arg4[%c0_34, %c0_35] : memref<384x64xf32, #tpu.memory_space<vmem>>, vector<384x64xf32>
    %cst_36 = arith.constant dense<0.000000e+00> : vector<32x64xf32>
    %35 = tpu.matmul %33, %34, %cst_36 {dimension_numbers = #tpu.dot_dimension_numbers<[1], [0], [0], [1], [0, 0, 1, 1], [], []>} : vector<32x384xf32>, vector<384x64xf32>, vector<32x64xf32> -> vector<32x64xf32>
    %cst_37 = arith.constant dense<0.000000e+00> : vector<64xf32>
    %36 = vector.multi_reduction <add>, %35, %cst_37 [0] : vector<32x64xf32> to vector<64xf32>
    %37 = vector.shape_cast %36 : vector<64xf32> to vector<1x64xf32>
    %38 = arith.mulf %35, %35 : vector<32x64xf32>
    %cst_38 = arith.constant dense<0.000000e+00> : vector<64xf32>
    %39 = vector.multi_reduction <add>, %38, %cst_38 [0] : vector<32x64xf32> to vector<64xf32>
    %40 = vector.shape_cast %39 : vector<64xf32> to vector<1x64xf32>
    %41 = tpu.concatenate %37, %40 in 0 : vector<1x64xf32>, vector<1x64xf32> -> vector<2x64xf32>
    %c0_39 = arith.constant 0 : index
    %c0_40 = arith.constant 0 : index
    %42 = vector.load %arg8[%c0_39, %c0_40] : memref<64x4xf32, #tpu.memory_space<vmem>>, vector<64x4xf32>
    %cst_41 = arith.constant dense<0.000000e+00> : vector<2x4xf32>
    %43 = tpu.matmul %41, %42, %cst_41 {dimension_numbers = #tpu.dot_dimension_numbers<[1], [0], [0], [1], [0, 0, 1, 1], [], []>} : vector<2x64xf32>, vector<64x4xf32>, vector<2x4xf32> -> vector<2x4xf32>
    %44 = vector.extract_strided_slice %43 {offsets = [0, 0], sizes = [1, 4], strides = [1, 1]} : vector<2x4xf32> to vector<1x4xf32>
    %45 = vector.extract_strided_slice %43 {offsets = [1, 0], sizes = [1, 4], strides = [1, 1]} : vector<2x4xf32> to vector<1x4xf32>
    %46 = arith.mulf %44, %44 : vector<1x4xf32>
    %47 = arith.subf %45, %46 : vector<1x4xf32>
    %c0_42 = arith.constant 0 : index
    %c0_43 = arith.constant 0 : index
    %48 = vector.load %arg6[%c0_42, %c0_43] : memref<2x4xf32, #tpu.memory_space<vmem>>, vector<1x4xf32>
    %cst_44 = arith.constant 9.99999974E-6 : f32
    %49 = vector.broadcast %cst_44 : f32 to vector<1x4xf32>
    %50 = arith.addf %47, %49 : vector<1x4xf32>
    %51 = math.rsqrt %50 : vector<1x4xf32>
    %52 = arith.mulf %48, %51 : vector<1x4xf32>
    %c1_45 = arith.constant 1 : index
    %c0_46 = arith.constant 0 : index
    %53 = vector.load %arg6[%c1_45, %c0_46] : memref<2x4xf32, #tpu.memory_space<vmem>>, vector<1x4xf32>
    %54 = arith.mulf %52, %44 : vector<1x4xf32>
    %55 = arith.subf %53, %54 : vector<1x4xf32>
    %56 = tpu.concatenate %52, %55 in 0 : vector<1x4xf32>, vector<1x4xf32> -> vector<2x4xf32>
    %c0_47 = arith.constant 0 : index
    %c0_48 = arith.constant 0 : index
    %57 = vector.load %arg9[%c0_47, %c0_48] : memref<4x64xf32, #tpu.memory_space<vmem>>, vector<4x64xf32>
    %cst_49 = arith.constant dense<0.000000e+00> : vector<2x64xf32>
    %58 = tpu.matmul %56, %57, %cst_49 {dimension_numbers = #tpu.dot_dimension_numbers<[1], [0], [0], [1], [0, 0, 1, 1], [], []>} : vector<2x4xf32>, vector<4x64xf32>, vector<2x64xf32> -> vector<2x64xf32>
    %59 = vector.extract_strided_slice %58 {offsets = [0, 0], sizes = [1, 64], strides = [1, 1]} : vector<2x64xf32> to vector<1x64xf32>
    %60 = vector.broadcast %59 : vector<1x64xf32> to vector<32x64xf32>
    %61 = arith.mulf %35, %60 : vector<32x64xf32>
    %62 = vector.extract_strided_slice %58 {offsets = [1, 0], sizes = [1, 64], strides = [1, 1]} : vector<2x64xf32> to vector<1x64xf32>
    %63 = vector.broadcast %62 : vector<1x64xf32> to vector<32x64xf32>
    %64 = arith.addf %61, %63 : vector<32x64xf32>
    %cst_50 = arith.constant 0.000000e+00 : f32
    %65 = vector.broadcast %cst_50 : f32 to vector<32x64xf32>
    %66 = arith.maximumf %64, %65 : vector<32x64xf32>
    %67 = vector.shape_cast %66 : vector<32x64xf32> to vector<2x16x64xf32>
    %c0_51 = arith.constant 0 : index
    %c1_52 = arith.constant 1 : index
    %c0_53 = arith.constant 0 : index
    %68 = vector.load %arg14[%c0_51, %c1_52, %c0_53] : memref<2x18x64xf32, #tpu.memory_space<vmem>>, vector<2x16x64xf32>
    tpu.vector_store %arg14[%c0_51, %c1_52, %c0_53], %67 {strides = array<i32>} : memref<2x18x64xf32, #tpu.memory_space<vmem>>, vector<2x16x64xf32>,
    %c0_54 = arith.constant 0 : index
    %c0_55 = arith.constant 0 : index
    %c0_56 = arith.constant 0 : index
    %69 = vector.load %arg14[%c0_54, %c0_55, %c0_56] : memref<2x18x64xf32, #tpu.memory_space<vmem>>, vector<2x16x64xf32>
    %70 = vector.shape_cast %69 : vector<2x16x64xf32> to vector<32x64xf32>
    %c0_57 = arith.constant 0 : index
    %c1_58 = arith.constant 1 : index
    %c0_59 = arith.constant 0 : index
    %71 = vector.load %arg14[%c0_57, %c1_58, %c0_59] : memref<2x18x64xf32, #tpu.memory_space<vmem>>, vector<2x16x64xf32>
    %72 = vector.shape_cast %71 : vector<2x16x64xf32> to vector<32x64xf32>
    %c0_60 = arith.constant 0 : index
    %c2_61 = arith.constant 2 : index
    %c0_62 = arith.constant 0 : index
    %73 = vector.load %arg14[%c0_60, %c2_61, %c0_62] : memref<2x18x64xf32, #tpu.memory_space<vmem>>, vector<2x16x64xf32>
    %74 = vector.shape_cast %73 : vector<2x16x64xf32> to vector<32x64xf32>
    %75 = tpu.concatenate %70, %72, %74 in 1 : vector<32x64xf32>, vector<32x64xf32>, vector<32x64xf32> -> vector<32x192xf32>
    %c0_63 = arith.constant 0 : index
    %c0_64 = arith.constant 0 : index
    %76 = vector.load %arg5[%c0_63, %c0_64] : memref<192x128xf32, #tpu.memory_space<vmem>>, vector<192x128xf32>
    %cst_65 = arith.constant dense<0.000000e+00> : vector<32x128xf32>
    %77 = tpu.matmul %75, %76, %cst_65 {dimension_numbers = #tpu.dot_dimension_numbers<[1], [0], [0], [1], [0, 0, 1, 1], [], []>} : vector<32x192xf32>, vector<192x128xf32>, vector<32x128xf32> -> vector<32x128xf32>
    %cst_66 = arith.constant dense<0.000000e+00> : vector<128xf32>
    %78 = vector.multi_reduction <add>, %77, %cst_66 [0] : vector<32x128xf32> to vector<128xf32>
    %79 = vector.shape_cast %78 : vector<128xf32> to vector<1x128xf32>
    %80 = arith.mulf %77, %77 : vector<32x128xf32>
    %cst_67 = arith.constant dense<0.000000e+00> : vector<128xf32>
    %81 = vector.multi_reduction <add>, %80, %cst_67 [0] : vector<32x128xf32> to vector<128xf32>
    %82 = vector.shape_cast %81 : vector<128xf32> to vector<1x128xf32>
    %83 = tpu.concatenate %79, %82 in 0 : vector<1x128xf32>, vector<1x128xf32> -> vector<2x128xf32>
    %c0_68 = arith.constant 0 : index
    %c0_69 = arith.constant 0 : index
    %84 = vector.load %arg10[%c0_68, %c0_69] : memref<128x8xf32, #tpu.memory_space<vmem>>, vector<128x8xf32>
    %cst_70 = arith.constant dense<0.000000e+00> : vector<2x8xf32>
    %85 = tpu.matmul %83, %84, %cst_70 {dimension_numbers = #tpu.dot_dimension_numbers<[1], [0], [0], [1], [0, 0, 1, 1], [], []>} : vector<2x128xf32>, vector<128x8xf32>, vector<2x8xf32> -> vector<2x8xf32>
    %86 = vector.extract_strided_slice %85 {offsets = [0, 0], sizes = [1, 8], strides = [1, 1]} : vector<2x8xf32> to vector<1x8xf32>
    %87 = vector.extract_strided_slice %85 {offsets = [1, 0], sizes = [1, 8], strides = [1, 1]} : vector<2x8xf32> to vector<1x8xf32>
    %88 = arith.mulf %86, %86 : vector<1x8xf32>
    %89 = arith.subf %87, %88 : vector<1x8xf32>
    %c0_71 = arith.constant 0 : index
    %c0_72 = arith.constant 0 : index
    %90 = vector.load %arg7[%c0_71, %c0_72] : memref<2x8xf32, #tpu.memory_space<vmem>>, vector<1x8xf32>
    %cst_73 = arith.constant 9.99999974E-6 : f32
    %91 = vector.broadcast %cst_73 : f32 to vector<1x8xf32>
    %92 = arith.addf %89, %91 : vector<1x8xf32>
    %93 = math.rsqrt %92 : vector<1x8xf32>
    %94 = arith.mulf %90, %93 : vector<1x8xf32>
    %c1_74 = arith.constant 1 : index
    %c0_75 = arith.constant 0 : index
    %95 = vector.load %arg7[%c1_74, %c0_75] : memref<2x8xf32, #tpu.memory_space<vmem>>, vector<1x8xf32>
    %96 = arith.mulf %94, %86 : vector<1x8xf32>
    %97 = arith.subf %95, %96 : vector<1x8xf32>
    %98 = tpu.concatenate %94, %97 in 0 : vector<1x8xf32>, vector<1x8xf32> -> vector<2x8xf32>
    %c0_76 = arith.constant 0 : index
    %c0_77 = arith.constant 0 : index
    %99 = vector.load %arg11[%c0_76, %c0_77] : memref<8x128xf32, #tpu.memory_space<vmem>>, vector<8x128xf32>
    %cst_78 = arith.constant dense<0.000000e+00> : vector<2x128xf32>
    %100 = tpu.matmul %98, %99, %cst_78 {dimension_numbers = #tpu.dot_dimension_numbers<[1], [0], [0], [1], [0, 0, 1, 1], [], []>} : vector<2x8xf32>, vector<8x128xf32>, vector<2x128xf32> -> vector<2x128xf32>
    %101 = vector.extract_strided_slice %100 {offsets = [0, 0], sizes = [1, 128], strides = [1, 1]} : vector<2x128xf32> to vector<1x128xf32>
    %102 = vector.broadcast %101 : vector<1x128xf32> to vector<32x128xf32>
    %103 = arith.mulf %77, %102 : vector<32x128xf32>
    %104 = vector.extract_strided_slice %100 {offsets = [1, 0], sizes = [1, 128], strides = [1, 1]} : vector<2x128xf32> to vector<1x128xf32>
    %105 = vector.broadcast %104 : vector<1x128xf32> to vector<32x128xf32>
    %106 = arith.addf %103, %105 : vector<32x128xf32>
    %cst_79 = arith.constant 0.000000e+00 : f32
    %107 = vector.broadcast %cst_79 : f32 to vector<32x128xf32>
    %108 = arith.maximumf %106, %107 : vector<32x128xf32>
    %c0_80 = arith.constant 0 : index
    %c0_81 = arith.constant 0 : index
    %109 = vector.load %arg12[%c0_80, %c0_81] : memref<32x128xf32, #tpu.memory_space<vmem>>, vector<32x128xf32>
    tpu.vector_store %arg12[%c0_80, %c0_81], %108 {strides = array<i32>} : memref<32x128xf32, #tpu.memory_space<vmem>>, vector<32x128xf32>,
    return
  }
}

</mosaic_0001>

<bundles_post_ra>
// kernel: run.1
= control target key start
LH: loop header
LB: loop body
LE: loop exit
PB: predicated region body
PF: predicated region fallthrough
CT: control target
= control target key end

     0   :  { %17 = vsyncpa [#allocation5], 0  ;;  %s2238_s0 = inlined_call_operand.vmem [shape: f32[16,32], index: 0, kind: input, shape index: {}]   ;;  %s2239_s1 = inlined_call_operand.vmem [shape: f32[2,18,72], index: 1, kind: input, shape index: {}]   ;;  %s2240_s2 = inlined_call_operand.hbm [shape: f32[32,16], index: 2, kind: input, shape index: {}]   ;;  %s2241_s3 = inlined_call_operand.hbm [shape: f32[32,64], index: 3, kind: input, shape index: {}]   ;;  %s2242_s4 = inlined_call_operand.vmem [shape: f32[384,64], index: 4, kind: input, shape index: {}]   ;;  %s2243_s5 = inlined_call_operand.vmem [shape: f32[192,128], index: 5, kind: input, shape index: {}]   ;;  %s2244_s6 = inlined_call_operand.hbm [shape: f32[2,4], index: 6, kind: input, shape index: {}]   ;;  %s2245_s7 = inlined_call_operand.hbm [shape: f32[2,8], index: 7, kind: input, shape index: {}]   ;;  %s2246_s8 = inlined_call_operand.vmem [shape: f32[64,4], index: 8, kind: input, shape index: {}]   ;;  %s2247_s9 = inlined_call_operand.vmem [shape: f32[4,64], index: 9, kind: input, shape index: {}]   ;;  %s2248_s10 = inlined_call_operand.vmem [shape: f32[128,8], index: 10, kind: input, shape index: {}]   ;;  %s2249_s11 = inlined_call_operand.hbm [shape: f32[8,128], index: 11, kind: input, shape index: {}]   ;;  %s2250_s12 = inlined_call_operand.vmem [shape: f32[32,128], index: 12, kind: output, shape index: {}]  }
   0x1   :  { %18 = vsyncpa [#allocation7], 0 }
   0x2   :  { %19 = vsyncpa [#allocation10], 0  ;;  %s1630_s21 = smov [#allocation6]   ;;  %s1631_s23 = smov [#allocation9]  }
   0x3   :  { %s41_s22 = sshll.u32 %s1630_s21, 4  ;;  %s68_s24 = sshll.u32 %s1631_s23, 4  ;;  %s42_s22 = int_to_ptr.vmem [resolvable:$true] %s41_s22  ;;  %s69_s24 = int_to_ptr.vmem [resolvable:$true] %s68_s24 }
   0x4   :  { %s1532_s25 = scalar_lea.vmem %s42_s22, 512  ;;  %p1537_p1 = scmp.lt.s32.totalorder %s42_s22, %s42_s22 }
   0x5   :  { %p1533_p0 = scmp.ne.s32.totalorder %s42_s22, %s1532_s25  ;;  %p1538_p2 = scmp.lt.s32.totalorder %s1532_s25, %s1532_s25 }
   0x7   :  { %p1539_p3 = por %p1538_p2, %p1537_p1 }
   0x9   :  { %p1540_p4 = pnand %p1539_p3, %p1533_p0 }
   0xb   :  { %1543 = shalt.err (!%p1540_p4)
}
   0xc   :  { %s1632_s26 = smov 128   ;;  %s1633_s27 = smov 8  }
   0xd   :  { %47 = dma.hbm_to_vmem [thread:$0]  %s2241_s3, 512, %s42_s22, [#allocation7], %s1632_s26, %s1632_s26, %s1633_s27  }
   0xe   :  { %s1552_s30 = scalar_lea.vmem %s69_s24, 32  ;;  %p1557_p6 = scmp.lt.s32.totalorder %s69_s24, %s69_s24 }
   0xf   :  { %p1553_p5 = scmp.ne.s32.totalorder %s69_s24, %s1552_s30  ;;  %p1558_p7 = scmp.lt.s32.totalorder %s1552_s30, %s1552_s30 }
  0x11   :  { %p1559_p8 = por %p1558_p7, %p1557_p6 }
  0x13   :  { %p1560_p9 = pnand %p1559_p8, %p1553_p5 }
  0x15   :  { %1563 = shalt.err (!%p1560_p9)
}
  0x16   :  { %71 = dma.hbm_to_vmem [thread:$0]  %s2245_s7, 32, %s69_s24, [#allocation10]  }
  0x17   :  { %s1634_s15 = smov [#allocation4]   ;;  %s1635_s17 = smov [#allocation8]  }
  0x18   :  { %s29_s16 = sshll.u32 %s1634_s15, 4  ;;  %s58_s18 = sshll.u32 %s1635_s17, 4  ;;  %s30_s16 = int_to_ptr.vmem [resolvable:$true] %s29_s16  ;;  %s59_s18 = int_to_ptr.vmem [resolvable:$true] %s58_s18 }
  0x19   :  { %s1572_s19 = scalar_lea.vmem %s30_s16, 512  ;;  %p1577_p11 = scmp.lt.s32.totalorder %s30_s16, %s30_s16 }
  0x1a   :  { %p1573_p10 = scmp.ne.s32.totalorder %s30_s16, %s1572_s19  ;;  %p1578_p12 = scmp.lt.s32.totalorder %s1572_s19, %s1572_s19 }
  0x1c   :  { %p1579_p13 = por %p1578_p12, %p1577_p11 }
  0x1e   :  { %p1580_p0 = pnand %p1579_p13, %p1573_p10 }
  0x20   :  { %1583 = shalt.err (!%p1580_p0)
}
  0x21   :  { %35 = dma.hbm_to_vmem [thread:$0]  %s2240_s2, 512, %s30_s16, [#allocation5], %s1632_s26, %s1632_s26, %s1633_s27  }
  0x22   :  { %s1592_s21 = scalar_lea.vmem %s59_s18, 32  ;;  %p1597_p2 = scmp.lt.s32.totalorder %s59_s18, %s59_s18 }
  0x23   :  { %p1593_p1 = scmp.ne.s32.totalorder %s59_s18, %s1592_s21  ;;  %p1598_p3 = scmp.lt.s32.totalorder %s1592_s21, %s1592_s21 }
  0x25   :  { %p1599_p4 = por %p1598_p3, %p1597_p2 }
  0x27   :  { %p1600_p5 = pnand %p1599_p4, %p1593_p1 }
  0x29   :  { %1603 = shalt.err (!%p1600_p5)
}
  0x2a   :  { %61 = dma.hbm_to_vmem [thread:$0]  %s2244_s6, 32, %s59_s18, [#allocation7]  }
  0x2b   :  { %s1636_s23 = smov [#allocation11]  }
  0x2c   :  { %s84_s24 = sshll.u32 %s1636_s23, 4  ;;  %s85_s24 = int_to_ptr.vmem [resolvable:$true] %s84_s24 }
  0x2d   :  { %s1612_s25 = scalar_lea.vmem %s85_s24, 128  ;;  %p1617_p7 = scmp.lt.s32.totalorder %s85_s24, %s85_s24 }
  0x2e   :  { %p1613_p6 = scmp.ne.s32.totalorder %s85_s24, %s1612_s25  ;;  %p1618_p8 = scmp.lt.s32.totalorder %s1612_s25, %s1612_s25 }
  0x30   :  { %p1619_p9 = por %p1618_p8, %p1617_p7 }
  0x32   :  { %p1620_p10 = pnand %p1619_p9, %p1613_p6 }
  0x34   :  { %1623 = shalt.err (!%p1620_p10)
}
  0x35   :  { %87 = dma.hbm_to_vmem [thread:$0]  %s2249_s11, 128, %s85_s24, [#allocation10]  }
  0x36   :  { %1624 = dma.done.wait [#allocation5], 512  }
  0x37   :  { %1625 = vsyncadd [#allocation5], 4294966784 }
  0x38   :  { %1626 = dma.done.wait [#allocation7], 544  }
  0x39   :  { %1627 = vsyncadd [#allocation7], 4294966752 }
  0x3a   :  { %1628 = dma.done.wait [#allocation10], 160  }
  0x3b   :  { %1629 = vsyncadd [#allocation10], 4294967136  ;;  %vm204_vm0 = vcmask 261120   ;;  %v203_v0 = vld [vmem:[#allocation6 + $0x18] sm:$0xff]  ;;  %v202_v1 = vld [vmem:[#allocation6 + $0x10] sm:$0xff]  ;;  %vm290_vm1 = vcmask 130048  }
  0x3c   :  { %1385 = vmatprep.subr.mxu1 %v203_v0  ;;  %v198_v2 = vld [vmem:[%s2238_s0] sm:$0xff]  ;;  %v201_v3 = vld [vmem:[#allocation6 + $0x8] sm:$0xff]  ;;  %vm124_vm2 = vcmask 1046528   ;;  %vm143_vm3 = vcmask 1045504   ;;  %v114_v13 = vld [vmem:[%s2239_s1 + $0x10] sm:$0x3] }
  0x3d   :  { %1386 = vmatpush3.msra.mxu1 %v203_v0  ;;  %1393 = vmatprep.mubr.msk.f32.mxu1 %vm204_vm0, %v198_v2  ;;  %v200_v4 = vld [vmem:[#allocation6] sm:$0xff]  ;;  %v199_v5 = vld [vmem:[%s2238_s0 + $0x8] sm:$0xff]  ;;  %v128_v14 = vrot.slane %v114_v13, 1  ;;  %v147_v15 = vrot.slane %v114_v13, 2  ;;  %v115_v16 = vld [vmem:[%s2239_s1 + $0x18] sm:$0xff]  ;;  %s1637_s3 = smov 124  }
  0x3e   :  { %1387 = vmatprep.subr.mxu1 %v202_v1  ;;  %v286_v6 = vld [vmem:[#allocation4] sm:$0xff]  ;;  %v113_v8 = vld [vmem:[%s2239_s1 + $0x8] sm:$0xff]  ;;  %v130_v20 = vrot.slane %v115_v16, 1  ;;  %v149_v25 = vrot.slane %v115_v16, 2  ;;  %s1638_s20 = smov 120   ;;  %v288_v37 = vld [vmem:[#allocation4 + $0x10] sm:$0xff] }
  0x3f   :  { %1388 = vmatpush3.msra.mxu1 %v202_v1  ;;  %v112_v7 = vld [vmem:[%s2239_s1] sm:$0xff]  ;;  %v126_v10 = vrot.slane %v113_v8, 1  ;;  %v145_v12 = vrot.slane %v113_v8, 2  ;;  %v287_v36 = vld [vmem:[#allocation4 + $0x8] sm:$0xff]  ;;  %v289_v38 = vld [vmem:[#allocation4 + $0x18] sm:$0xff]  ;;  %s1640_s6 = smov 64  }
  0x40   :  { %1389 = vmatprep.subr.mxu1 %v201_v3  ;;  %v125_v9 = vrot.slane %v112_v7, 1  ;;  %v144_v11 = vrot.slane %v112_v7, 2  ;;  %v1746_v17 = vld [vmem:[%s2239_s1 + $0x20] sm:$0xff]  ;;  %v456_v39 = vld [vmem:[%s2242_s4 + $0xf8] sm:$0xff]  ;;  %v455_v42 = vld [vmem:[%s2242_s4 + $0xf0] sm:$0xff]  ;;  %vm404_vm4 = vcmask 523264  }
  0x41   :  { %1390 = vmatpush3.msra.mxu1 %v201_v3  ;;  %v131_v21 = vrot.slane %v1746_v17, 1  ;;  %v129_v23 = vsel %vm124_vm2, %v126_v10, %v128_v14  ;;  %v148_v24 = vsel %vm143_vm3, %v145_v12, %v147_v15  ;;  %v150_v28 = vrot.slane %v1746_v17, 2  ;;  %v472_v40 = vld [vmem:[%s2242_s4 + $0x178] sm:$0xff]  ;;  %v471_v43 = vld [vmem:[%s2242_s4 + $0x170] sm:$0xff]  ;;  %v454_v45 = vld [vmem:[%s2242_s4 + $0xe8] sm:$0xff] }
  0x42   :  { %1391 = vmatprep.subr.mxu1 %v200_v4  ;;  %v127_v18 = vsel %vm124_vm2, %v125_v9, %v126_v10  ;;  %v146_v19 = vsel %vm143_vm3, %v144_v11, %v145_v12  ;;  %v140_v26 = vmax.f32 %v113_v8, %v129_v23  ;;  %v440_v41 = vld [vmem:[%s2242_s4 + $0x78] sm:$0xff]  ;;  %1406 = vmatprep.subr.mxu0 %v472_v40  ;;  %v439_v44 = vld [vmem:[%s2242_s4 + $0x70] sm:$0xff]  ;;  %v470_v46 = vld [vmem:[%s2242_s4 + $0x168] sm:$0xff]  ;;  %v1639_v12 = vmov 0.0  }
  0x43   :  { %1392 = vmatpush3.msra.mxu1 %v200_v4  ;;  %v139_v22 = vmax.f32 %v112_v7, %v127_v18  ;;  %v132_v27 = vsel %vm124_vm2, %v130_v20, %v131_v21  ;;  %v151_v32 = vsel %vm143_vm3, %v149_v25, %v150_v28  ;;  %1407 = vmatpush3.msra.mxu0 %v472_v40  ;;  %v438_v47 = vld [vmem:[%s2242_s4 + $0x68] sm:$0xff]  ;;  %v453_v48 = vld [vmem:[%s2242_s4 + $0xe0] sm:$0xff]  ;;  %v452_v51 = vld [vmem:[%s2242_s4 + $0xd8] sm:$0xff]  ;;  %vm1641_vm5 = vmmov 0  }
  0x44   :  { %1394 = vmatmul.mubr.msk.f32.vlgmr.msra.gmra.mxu1 %vm204_vm0, %v199_v5  ;;  %v141_v30 = vmax.f32 %v115_v16, %v132_v27  ;;  %v1759_v31 = vmax.f32 %v140_v26, %v148_v24  ;;  %1408 = vmatprep.subr.mxu0 %v471_v43  ;;  %v469_v49 = vld [vmem:[%s2242_s4 + $0x160] sm:$0xff]  ;;  %v468_v52 = vld [vmem:[%s2242_s4 + $0x158] sm:$0xff]  ;;  %v451_v54 = vld [vmem:[%s2242_s4 + $0xd0] sm:$0xff]  ;;  %103 = vst [vmem:[#allocation2] sm:$0x1] %v1639_v12  ;;  %vm673_vm6 = vcmask 1040384  }
  0x45   :  { %1400 = vmatprep.mubr.msk.f32.mxu1 %vm290_vm1, %v286_v6  ;;  %v1757_v29 = vmax.f32 %v139_v22, %v146_v19  ;;  %1409 = vmatpush3.msra.mxu0 %v471_v43  ;;  %v437_v50 = vld [vmem:[%s2242_s4 + $0x60] sm:$0xff]  ;;  %v436_v53 = vld [vmem:[%s2242_s4 + $0x58] sm:$0xff]  ;;  %v467_v55 = vld [vmem:[%s2242_s4 + $0x150] sm:$0xff]  ;;  %104 = vst [vmem:[#allocation2 + $0x18] sm:$0x1] %v1639_v12  ;;  %vm780_vm7 = vcmask 1043456  }
  0x46   :  { %168 = vrot.lane.b32.xlu1 %v1759_v31, %s1637_s3  ;;  %v1768_v33 = vmax.f32 %v141_v30, %v151_v32  ;;  %1410 = vmatprep.subr.mxu0 %v470_v46  ;;  %v435_v56 = vld [vmem:[%s2242_s4 + $0x50] sm:$0xff]  ;;  %v450_v57 = vld [vmem:[%s2242_s4 + $0xc8] sm:$0xff]  ;;  %v449_v60 = vld [vmem:[%s2242_s4 + $0xc0] sm:$0xff]  ;;  %105 = vst [vmem:[#allocation2 + $0x11] sm:$0x1] %v1639_v12  ;;  %vm776_vm8 = vcmask 31744  }
  0x47   :  { %166 = vrot.lane.b32.xlu0 %v1757_v29, %s1637_s3  ;;  %1411 = vmatpush3.msra.mxu0 %v470_v46  ;;  %v466_v58 = vld [vmem:[%s2242_s4 + $0x148] sm:$0xff]  ;;  %v465_v61 = vld [vmem:[%s2242_s4 + $0x140] sm:$0xff]  ;;  %v448_v63 = vld [vmem:[%s2242_s4 + $0xb8] sm:$0xff]  ;;  %106 = vst [vmem:[#allocation2 + $0x29] sm:$0x1] %v1639_v12  ;;  %vm107_vm9 = vcmask 516096  }
  0x48   :  { %1412 = vmatprep.subr.mxu0 %v469_v49  ;;  %v434_v59 = vld [vmem:[%s2242_s4 + $0x48] sm:$0xff]  ;;  %v433_v62 = vld [vmem:[%s2242_s4 + $0x40] sm:$0xff]  ;;  %v464_v0 = vld [vmem:[%s2242_s4 + $0x138] sm:$0xff]  ;;  %108 = vst.msk [vmem:[#allocation3] sm:$0x1] %vm107_vm9, %v1639_v12  ;;  %vm1160_vm10 = vcmask 64512  }
  0x49   :  { %1413 = vmatpush3.msra.mxu0 %v469_v49  ;;  %v432_v1 = vld [vmem:[%s2242_s4 + $0x38] sm:$0xff]  ;;  %v447_v2 = vld [vmem:[%s2242_s4 + $0xb0] sm:$0xff]  ;;  %v446_v5 = vld [vmem:[%s2242_s4 + $0xa8] sm:$0xff]  ;;  %109 = vst.msk [vmem:[#allocation3 + $0x18] sm:$0x1] %vm107_vm9, %v1639_v12 }
  0x4a   :  { %170 = vrot.lane.b32.xlu1 %v1768_v33, %s1637_s3  ;;  %1414 = vmatprep.subr.mxu0 %v468_v52  ;;  %v463_v3 = vld [vmem:[%s2242_s4 + $0x130] sm:$0xff]  ;;  %v117_v6 = vld [vmem:[%s2239_s1 + $0x28] sm:$0x3]  ;;  %v445_v9 = vld [vmem:[%s2242_s4 + $0xa0] sm:$0xff]  ;;  %110 = vst.msk [vmem:[#allocation3 + $0x11] sm:$0x1] %vm107_vm9, %v1639_v12 }
  0x4b   :  { %182 = vrot.lane.b32.xlu0 %v1757_v29, %s1638_s20  ;;  %1415 = vmatpush3.msra.mxu0 %v468_v52  ;;  %v431_v4 = vld [vmem:[%s2242_s4 + $0x30] sm:$0xff]  ;;  %v462_v7 = vld [vmem:[%s2242_s4 + $0x128] sm:$0xff]  ;;  %v461_v10 = vld [vmem:[%s2242_s4 + $0x120] sm:$0xff]  ;;  %v133_v13 = vrot.slane %v117_v6, 1  ;;  %v152_v23 = vrot.slane %v117_v6, 2 }
  0x4c   :  { %1416 = vmatprep.subr.mxu0 %v467_v55  ;;  %v430_v8 = vld [vmem:[%s2242_s4 + $0x28] sm:$0xff]  ;;  %v429_v11 = vld [vmem:[%s2242_s4 + $0x20] sm:$0xff]  ;;  %v444_v14 = vld [vmem:[%s2242_s4 + $0x98] sm:$0xff]  ;;  %111 = vst.msk [vmem:[#allocation3 + $0x29] sm:$0x1] %vm107_vm9, %v1639_v12 }
  0x4d   :  { %1417 = vmatpush3.msra.mxu0 %v467_v55  ;;  %v460_v15 = vld [vmem:[%s2242_s4 + $0x118] sm:$0xff]  ;;  %v443_v18 = vld [vmem:[%s2242_s4 + $0x90] sm:$0xff]  ;;  %v134_v22 = vsel %vm124_vm2, %v131_v21, %v133_v13  ;;  %v442_v24 = vld [vmem:[%s2242_s4 + $0x88] sm:$0xff] }
  0x4e   :  { %1418 = vmatprep.subr.mxu0 %v466_v58  ;;  %v428_v16 = vld [vmem:[%s2242_s4 + $0x18] sm:$0xff]  ;;  %v459_v19 = vld [vmem:[%s2242_s4 + $0x110] sm:$0xff]  ;;  %v458_v25 = vld [vmem:[%s2242_s4 + $0x108] sm:$0xff]  ;;  %v142_v27 = vmax.f32 %v1746_v17, %v134_v22 }
  0x4f   :  { %184 = vrot.lane.b32.xlu0 %v1759_v31, %s1638_s20  ;;  %1419 = vmatpush3.msra.mxu0 %v466_v58  ;;  %v427_v20 = vld [vmem:[%s2242_s4 + $0x10] sm:$0xff]  ;;  %v426_v26 = vld [vmem:[%s2242_s4 + $0x8] sm:$0xff]  ;;  %v441_v21 = vld [vmem:[%s2242_s4 + $0x80] sm:$0xff] }
  0x50   :  { %1420 = vmatprep.subr.mxu0 %v465_v61  ;;  %v457_v30 = vld [vmem:[%s2242_s4 + $0x100] sm:$0xff] }
  0x51   :  { %1421 = vmatpush3.msra.mxu0 %v465_v61  ;;  %v425_v32 = vld [vmem:[%s2242_s4] sm:$0xff] }
  0x52   :  { %1422 = vmatprep.subr.mxu0 %v464_v0  ;;  %v679_v6 = vld [vmem:[%s2246_s8 + $0x20] sm:$0xff] }
  0x53   :  { %1423 = vmatpush3.msra.mxu0 %v464_v0 }
  0x54   :  { %1424 = vmatprep.subr.mxu0 %v463_v3 }
  0x55   :  { %1425 = vmatpush3.msra.mxu0 %v463_v3  ;;  %v682_v3 = vld [vmem:[%s2246_s8 + $0x38] sm:$0xff] }
  0x56   :  { %1426 = vmatprep.subr.mxu0 %v462_v7 }
  0x57   :  { %1427 = vmatpush3.msra.mxu0 %v462_v7  ;;  %v678_v7 = vld [vmem:[%s2246_s8 + $0x18] sm:$0xff] }
  0x58   :  { %1428 = vmatprep.subr.mxu0 %v461_v10 }
  0x59   :  { %1429 = vmatpush3.msra.mxu0 %v461_v10  ;;  %v675_v10 = vld [vmem:[%s2246_s8] sm:$0xff] }
  0x5a   :  { %1430 = vmatprep.subr.mxu0 %v460_v15 }
  0x5b   :  { %1431 = vmatpush3.msra.mxu0 %v460_v15 }
  0x5c   :  { %1432 = vmatprep.subr.mxu0 %v459_v19 }
  0x5d   :  { %1433 = vmatpush3.msra.mxu0 %v459_v19 }
  0x5e   :  { %1434 = vmatprep.subr.mxu0 %v458_v25 }
  0x5f   :  { %1435 = vmatpush3.msra.mxu0 %v458_v25 }
  0x60   :  { %1436 = vmatprep.subr.mxu0 %v457_v30 }
  0x61   :  { %1437 = vmatpush3.msra.mxu0 %v457_v30 }
  0x62   :  { %1463 = vmatprep.subr.mxu0 %v1639_v12 }
  0xb8   :  { %v169_v40 = vpop.permute.xlu1 %168 }
  0xbc   :  { %v171_v43 = vpop.permute.xlu1 %170 }
 0x104   :  { %v1395_v34 = vpop.f32.mrf.mxu1 }
 0x105   :  { %1396 = vmatprep.subr.mxu1 %v1395_v34 }
 0x106   :  { %v277_v35 = vpop.f32.mrf.mxu1  ;;  %1397 = vmatpush3.msra.mxu1 %v1395_v34  ;;  %v153_v34 = vsel %vm143_vm3, %v150_v28, %v152_v23 }
 0x107   :  { %1398 = vmatprep.subr.mxu1 %v277_v35 }
 0x108   :  { %1399 = vmatpush3.msra.mxu1 %v277_v35 }
 0x109   :  { %1401 = vmatmul.mubr.msk.f32.vlgmr.msra.gmra.mxu1 %vm290_vm1, %v287_v36  ;;  %1291 = vmatprep.subr.mxu1 %v456_v39  ;;  %v161_v36 = vmax.f32 %v142_v27, %v153_v34 }
 0x10a   :  { %1403 = vmatprep.mubr.msk.f32.mxu1 %vm290_vm1, %v288_v37  ;;  %1292 = vmatpush3.msra.mxu1 %v440_v41 }
 0x10b   :  { %1293 = vmatprep.subr.mxu1 %v455_v42  ;;  %v179_v42 = vmax.f32 %v1759_v31, %v169_v40 }
 0x10c   :  { %1294 = vmatpush3.msra.mxu1 %v439_v44 }
 0x10d   :  { %1404 = vmatmul.mubr.msk.f32.gmra.mxu1 %vm290_vm1, %v289_v38  ;;  %1295 = vmatprep.subr.mxu1 %v454_v45  ;;  %v167_v38 = vpop.permute.xlu0 %166 }
 0x10e   :  { %1296 = vmatpush3.msra.mxu1 %v438_v47  ;;  %v178_v44 = vmax.f32 %v1757_v29, %v167_v38 }
 0x10f   :  { %1297 = vmatprep.subr.mxu1 %v453_v48 }
 0x110   :  { %1298 = vmatpush3.msra.mxu1 %v437_v50 }
 0x111   :  { %1299 = vmatprep.subr.mxu1 %v452_v51  ;;  %v183_v39 = vpop.permute.xlu0 %182 }
 0x112   :  { %1300 = vmatpush3.msra.mxu1 %v436_v53  ;;  %v194_v47 = vmax.f32 %v178_v44, %v183_v39  ;;  %v180_v53 = vmax.f32 %v1768_v33, %v171_v43 }
 0x113   :  { %1301 = vmatprep.subr.mxu1 %v451_v54 }
 0x114   :  { %1302 = vmatpush3.msra.mxu1 %v435_v56 }
 0x115   :  { %1303 = vmatprep.subr.mxu1 %v450_v57  ;;  %v185_v41 = vpop.permute.xlu0 %184 }
 0x116   :  { %1304 = vmatpush3.msra.mxu1 %v434_v59  ;;  %v195_v45 = vmax.f32 %v179_v42, %v185_v41 }
 0x117   :  { %1305 = vmatprep.subr.mxu1 %v449_v60 }
 0x118   :  { %1306 = vmatpush3.msra.mxu1 %v433_v62 }
 0x119   :  { %1307 = vmatprep.subr.mxu1 %v448_v63 }
 0x11a   :  { %1308 = vmatpush3.msra.mxu1 %v432_v1 }
 0x11b   :  { %1309 = vmatprep.subr.mxu1 %v447_v2 }
 0x11c   :  { %1310 = vmatpush3.msra.mxu1 %v431_v4  ;;  %v681_v4 = vld [vmem:[%s2246_s8 + $0x30] sm:$0xff] }
 0x11d   :  { %1311 = vmatprep.subr.mxu1 %v446_v5  ;;  %v680_v5 = vld [vmem:[%s2246_s8 + $0x28] sm:$0xff] }
 0x11e   :  { %1312 = vmatpush3.msra.mxu1 %v430_v8  ;;  %v677_v8 = vld [vmem:[%s2246_s8 + $0x10] sm:$0xff] }
 0x11f   :  { %1313 = vmatprep.subr.mxu1 %v445_v9  ;;  %v676_v9 = vld [vmem:[%s2246_s8 + $0x8] sm:$0xff] }
 0x120   :  { %1314 = vmatpush3.msra.mxu1 %v429_v11 }
 0x121   :  { %1315 = vmatprep.subr.mxu1 %v444_v14 }
 0x122   :  { %1316 = vmatpush3.msra.mxu1 %v428_v16 }
 0x123   :  { %1317 = vmatprep.subr.mxu1 %v443_v18 }
 0x124   :  { %1318 = vmatpush3.msra.mxu1 %v427_v20 }
 0x125   :  { %1319 = vmatprep.subr.mxu1 %v442_v24 }
 0x126   :  { %1320 = vmatpush3.msra.mxu1 %v426_v26 }
 0x127   :  { %1321 = vmatprep.subr.mxu1 %v441_v21 }
 0x128   :  { %1322 = vmatpush3.msra.mxu1 %v425_v32 }
 0x129   :  { %1444 = vmatprep.subr.mxu1 %v1639_v12 }
 0x1c9   :  { %v1402_v35 = vpop.f32.mrf.mxu1 }
 0x1ca   :  { %394 = vrot.lane.b32.xlu0 %v1402_v35, %s1640_s6 }
 0x1cb   :  { %v369_v37 = vpop.f32.mrf.mxu1 }
 0x1cc   :  { %392 = vrot.lane.b32.xlu1 %v369_v37, %s1640_s6 }
 0x1cd   :  { %v1405_v17 = vpop.f32.mrf.mxu1 }
 0x1ce   :  { %172 = vrot.lane.b32.xlu0 %v161_v36, %s1637_s3 }
 0x1cf   :  { %v379_v28 = vpop.f32.mrf.mxu1 }
 0x1d0   :  { %186 = vrot.lane.b32.xlu1 %v1768_v33, %s1638_s20 }
 0x1d2   :  { %188 = vrot.lane.b32.xlu0 %v161_v36, %s1638_s20 }
 0x1d4   :  { %396 = vrot.lane.b32.xlu1 %v379_v28, %s1640_s6 }
 0x1d8   :  { %398 = vrot.lane.b32.xlu1 %v1405_v17, %s1640_s6 }
 0x23c   :  { %v395_v46 = vpop.permute.xlu0 %394 }
 0x23d   :  { %v406_v48 = vsel %vm404_vm4, %v195_v45, %v395_v46 }
 0x23e   :  { %410 = vst [vmem:[#allocation2 + $0x9] sm:$0xff] %v406_v48  ;;  %v393_v49 = vpop.permute.xlu1 %392 }
 0x23f   :  { %v405_v50 = vsel %vm404_vm4, %v194_v47, %v393_v49 }
 0x240   :  { %409 = vst [vmem:[#allocation2 + $0x1] sm:$0xff] %v405_v50  ;;  %v173_v51 = vpop.permute.xlu0 %172  ;;  %537 = vmatprep.mubr.f32.mxu1 %v405_v50 }
 0x241   :  { %v181_v54 = vmax.f32 %v161_v36, %v173_v51 }
 0x242   :  { %v187_v52 = vpop.permute.xlu1 %186 }
 0x243   :  { %v196_v31 = vmax.f32 %v180_v53, %v187_v52 }
 0x244   :  { %v189_v29 = vpop.permute.xlu0 %188 }
 0x245   :  { %v422_v59 = vld [vmem:[#allocation2 + $0xa] sm:$0xff]  ;;  %v197_v60 = vmax.f32 %v181_v54, %v189_v29 }
 0x246   :  { %v397_v55 = vpop.permute.xlu1 %396 }
 0x247   :  { %v407_v56 = vsel %vm404_vm4, %v196_v31, %v397_v55  ;;  %v421_v57 = vld [vmem:[#allocation2 + $0x2] sm:$0xff] }
 0x248   :  { %v413_v58 = vld [vmem:[#allocation2] sm:$0xff]  ;;  %411 = vst [vmem:[#allocation2 + $0x19] sm:$0xff] %v407_v56  ;;  %1438 = vmatprep.mubr.f32.mxu0 %v421_v57  ;;  %v414_v63 = vld [vmem:[#allocation2 + $0x8] sm:$0xff] }
 0x249   :  { %538 = vmatmul.mubr.f32.vlgmr.msra.gmra.mxu1 %v413_v58  ;;  %1439 = vmatmul.mubr.f32.vlgmr.msra.gmra.mxu0 %v422_v59 }
 0x24a   :  { %542 = vmatprep.mubr.f32.mxu1 %v406_v48  ;;  %v399_v61 = vpop.permute.xlu1 %398  ;;  %1445 = vmatpush3.msra.mxu1 %v682_v3 }
 0x24b   :  { %v408_v62 = vsel %vm404_vm4, %v197_v60, %v399_v61  ;;  %1446 = vmatprep.subr.mxu1 %v1639_v12 }
 0x24c   :  { %412 = vst [vmem:[#allocation2 + $0x21] sm:$0xff] %v408_v62  ;;  %1447 = vmatpush3.msra.mxu1 %v681_v4 }
 0x24d   :  { %543 = vmatmul.mubr.f32.gmra.mxu1 %v414_v63  ;;  %1448 = vmatprep.subr.mxu1 %v1639_v12 }
 0x24e   :  { %547 = vmatprep.mubr.f32.mxu1 %v407_v56  ;;  %1449 = vmatpush3.msra.mxu1 %v680_v5 }
 0x24f   :  { %v415_v33 = vld [vmem:[#allocation2 + $0x18] sm:$0xff]  ;;  %1450 = vmatprep.subr.mxu1 %v1639_v12 }
 0x250   :  { %1451 = vmatpush3.msra.mxu1 %v679_v6 }
 0x251   :  { %548 = vmatmul.mubr.f32.gmra.mxu1 %v415_v33  ;;  %1452 = vmatprep.subr.mxu1 %v1639_v12  ;;  %v775_v33 = vld [vmem:[%s2247_s9] sm:$0xf] }
 0x252   :  { %552 = vmatprep.mubr.f32.mxu1 %v408_v62  ;;  %1453 = vmatpush3.msra.mxu1 %v678_v7  ;;  %v761_v7 = vld [vmem:[#allocation8] sm:$0x1] }
 0x253   :  { %v423_v0 = vld [vmem:[#allocation2 + $0x1a] sm:$0xff]  ;;  %v424_v2 = vld [vmem:[#allocation2 + $0x22] sm:$0xff]  ;;  %1454 = vmatprep.subr.mxu1 %v1639_v12  ;;  %1464 = vmatpush3.msk.msra.mxu0 %vm780_vm7, %v775_v33 }
 0x254   :  { %v416_v1 = vld [vmem:[#allocation2 + $0x20] sm:$0xff]  ;;  %1441 = vmatprep.mubr.f32.mxu0 %v423_v0  ;;  %1455 = vmatpush3.msra.mxu1 %v677_v8 }
 0x255   :  { %553 = vmatmul.mubr.f32.gmra.mxu1 %v416_v1  ;;  %1442 = vmatmul.mubr.f32.gmra.mxu0 %v424_v2 }
 0x256   :  { %1460 = vmatprep.mubr.msk.f32.mxu1 %vm1641_vm5, %v1639_v12  ;;  %1465 = vmatprep.mubr.msk.f32.mxu0 %vm1641_vm5, %v1639_v12 }
 0x257   :  { %1456 = vmatprep.subr.mxu1 %v1639_v12  ;;  %946 = vmatprep.subr.mxu0 %v1639_v12 }
 0x258   :  { %1457 = vmatpush3.msra.mxu1 %v676_v9 }
 0x259   :  { %1458 = vmatprep.subr.mxu1 %v1639_v12 }
 0x25a   :  { %1459 = vmatpush3.msra.mxu1 %v675_v10  ;;  %v768_v10 = vld [vmem:[#allocation8 + $0x1] sm:$0x1] }
 0x25b   :  { %1468 = vmatprep.subr.mxu1 %v1639_v12 }
 0x309   :  { %v1323_v11 = vpop.f32.mrf.mxu1  ;;  %v1440_v14 = vpop.f32.mrf.mxu0 }
 0x30b   :  { %v1324_v13 = vpop.f32.mrf.mxu1  ;;  %v624_v19 = vpop.f32.mrf.mxu0 }
 0x30c   :  { %v1325_v16 = vadd.f32 %v1324_v13, %v1323_v11 }
 0x30d   :  { %v1326_v15 = vpop.f32.mrf.mxu1 }
 0x30e   :  { %v1992_v24 = vadd.f32 %v1325_v16, %v624_v19  ;;  %v925_v16 = vld [vmem:[%s2243_s5 + $0x78] sm:$0xff]  ;;  %v923_v19 = vld [vmem:[%s2243_s5 + $0x68] sm:$0xff] }
 0x30f   :  { %v1327_v18 = vpop.f32.mrf.mxu1 }
 0x310   :  { %v1328_v20 = vadd.f32 %v1327_v18, %v1326_v15  ;;  %v656_v30 = vmul.f32 %v1992_v24, %v1992_v24  ;;  %v643_v17 = vsel %vm404_vm4, %v1992_v24, 0.0  ;;  %v924_v18 = vld [vmem:[%s2243_s5 + $0x70] sm:$0xff] }
 0x311   :  { %v1329_v22 = vpop.f32.mrf.mxu1 }
 0x312   :  { %v1990_v23 = vadd.f32 %v1440_v14, %v1328_v20  ;;  %v660_v41 = vsel %vm404_vm4, %v656_v30, 0.0  ;;  %v922_v20 = vld [vmem:[%s2243_s5 + $0x60] sm:$0xff]  ;;  %v916_v30 = vld [vmem:[%s2243_s5 + $0x30] sm:$0xff] }
 0x313   :  { %v1330_v25 = vpop.f32.mrf.mxu1 }
 0x314   :  { %v657_v26 = vmul.f32 %v1990_v23, %v1990_v23  ;;  %v644_v32 = vsel %vm404_vm4, %v1990_v23, 0.0  ;;  %v1331_v34 = vadd.f32 %v1330_v25, %v1329_v22  ;;  %v921_v22 = vld [vmem:[%s2243_s5 + $0x58] sm:$0xff]  ;;  %v920_v25 = vld [vmem:[%s2243_s5 + $0x50] sm:$0xff] }
 0x315   :  { %v1332_v21 = vpop.f32.mrf.mxu1  ;;  %v1443_v27 = vpop.f32.mrf.mxu0  ;;  %v645_v40 = vadd.f32 %v644_v32, %v643_v17  ;;  %v915_v32 = vld [vmem:[%s2243_s5 + $0x28] sm:$0xff]  ;;  %v910_v17 = vld [vmem:[%s2243_s5] sm:$0xff] }
 0x316   :  { %v661_v28 = vsel %vm404_vm4, %v657_v26, 0.0  ;;  %v919_v26 = vld [vmem:[%s2243_s5 + $0x48] sm:$0xff] }
 0x317   :  { %v1333_v35 = vpop.f32.mrf.mxu1  ;;  %v634_v37 = vpop.f32.mrf.mxu0  ;;  %v662_v47 = vadd.f32 %v661_v28, %v660_v41  ;;  %v933_v28 = vld [vmem:[%s2243_s5 + $0xb8] sm:$0xff]  ;;  %v931_v41 = vld [vmem:[%s2243_s5 + $0xa8] sm:$0xff] }
 0x318   :  { %v1334_v36 = vadd.f32 %v1333_v35, %v1332_v21  ;;  %v2003_v38 = vadd.f32 %v1331_v34, %v634_v37  ;;  %v918_v21 = vld [vmem:[%s2243_s5 + $0x40] sm:$0xff]  ;;  %v913_v35 = vld [vmem:[%s2243_s5 + $0x18] sm:$0xff]  ;;  %v911_v37 = vld [vmem:[%s2243_s5 + $0x8] sm:$0xff] }
 0x319   :  { %v914_v34 = vld [vmem:[%s2243_s5 + $0x20] sm:$0xff] }
 0x31a   :  { %v2005_v39 = vadd.f32 %v1443_v27, %v1334_v36  ;;  %v646_v42 = vsel %vm404_vm4, %v2003_v38, 0.0  ;;  %v658_v43 = vmul.f32 %v2003_v38, %v2003_v38  ;;  %v917_v27 = vld [vmem:[%s2243_s5 + $0x38] sm:$0xff]  ;;  %v912_v36 = vld [vmem:[%s2243_s5 + $0x10] sm:$0xff] }
 0x31b   :  { %v647_v46 = vadd.f32 %v646_v42, %v645_v40  ;;  %v932_v40 = vld [vmem:[%s2243_s5 + $0xb0] sm:$0xff]  ;;  %v930_v42 = vld [vmem:[%s2243_s5 + $0xa0] sm:$0xff] }
 0x31c   :  { %v648_v44 = vsel %vm404_vm4, %v2005_v39, 0.0  ;;  %v659_v45 = vmul.f32 %v2005_v39, %v2005_v39  ;;  %v663_v48 = vsel %vm404_vm4, %v658_v43, 0.0  ;;  %v929_v43 = vld [vmem:[%s2243_s5 + $0x98] sm:$0xff] }
 0x31d   :  { %v649_v50 = vadd.f32 %v648_v44, %v647_v46  ;;  %v664_v51 = vadd.f32 %v663_v48, %v662_v47  ;;  %v928_v44 = vld [vmem:[%s2243_s5 + $0x90] sm:$0xff]  ;;  %v854_v46 = vlaneseq }
 0x31e   :  { %v665_v49 = vsel %vm404_vm4, %v659_v45, 0.0  ;;  %v927_v45 = vld [vmem:[%s2243_s5 + $0x88] sm:$0xff] }
 0x31f   :  { %v650_v52 = vrot.slane %v649_v50, 4  ;;  %v666_v53 = vadd.f32 %v665_v49, %v664_v51  ;;  %v2123_v47 = vshrl.u32 %v854_v46, 7 }
 0x321   :  { %v651_v31 = vadd.f32 %v650_v52, %v649_v50  ;;  %v667_v54 = vrot.slane %v666_v53, 4  ;;  %v856_v48 = vsub.s32 0, %v2123_v47  ;;  %v864_v49 = vsub.s32 1, %v2123_v47 }
 0x323   :  { %v652_v55 = vrot.slane %v651_v31, 2  ;;  %v668_v29 = vadd.f32 %v667_v54, %v666_v53 }
 0x325   :  { %v653_v56 = vadd.f32 %v652_v55, %v651_v31  ;;  %v669_v57 = vrot.slane %v668_v29, 2 }
 0x327   :  { %v654_v58 = vrot.slane %v653_v56, 1  ;;  %v670_v59 = vadd.f32 %v669_v57, %v668_v29 }
 0x329   :  { %v671_v60 = vrot.slane %v670_v59, 1  ;;  %v655_v61 = vadd.f32 %v654_v58, %v653_v56  ;;  %v926_v56 = vld [vmem:[%s2243_s5 + $0x80] sm:$0xff] }
 0x32b   :  { %v672_v62 = vadd.f32 %v671_v60, %v670_v59 }
 0x32d   :  { %v674_v63 = vsel %vm673_vm6, %v655_v61, %v672_v62 }
 0x32e   :  { %1461 = vmatmul.mubr.msk.f32.vlgmr.msra.gmra.mxu1 %vm404_vm4, %v674_v63 }
 0x32f   :  { %1500 = vmatprep.mubr.msk.f32.mxu1 %vm1641_vm5, %v1639_v12 }
 0x3ee   :  { %v752_v0 = vpop.f32.mrf.mxu1 }
 0x3ef   :  { %v756_v1 = vmul.f32 %v752_v0, %v752_v0 }
 0x3f0   :  { %v1462_v2 = vpop.f32.mrf.mxu1 }
 0x3f1   :  { %v758_v3 = vrot.slane %v756_v1, 7 }
 0x3f3   :  { %v760_v4 = vsub.f32 %v752_v0, %v758_v3 }
 0x3f5   :  { %v762_v5 = vadd.f32 1e-05, %v760_v4 }
 0x3f7   :  { %1520 = vrsqrt.f32 %v762_v5 }
 0x404   :  { %v1521_v6 = vpop.eup %1520 }
 0x405   :  { %v765_v8 = vrot.slane %v1521_v6, 1 }
 0x407   :  { %v767_v9 = vmul.f32 %v765_v8, %v761_v7 }
 0x409   :  { %v769_v11 = vmul.f32 %v767_v9, %v752_v0  ;;  %v1069_v0 = vld [vmem:[%s2248_s10 + $0x78] sm:$0xff] }
 0x40a   :  { %1469 = vmatpush3.msra.mxu1 %v1069_v0 }
 0x40b   :  { %v770_v13 = vsub.f32 %v768_v10, %v769_v11  ;;  %1470 = vmatprep.subr.mxu1 %v1639_v12 }
 0x40d   :  { %v772_v14 = vrot.slane %v770_v13, 7 }
 0x40f   :  { %v774_v15 = vsel %vm673_vm6, %v767_v9, %v772_v14 }
 0x410   :  { %1466 = vmatmul.mubr.msk.f32.vlgmr.msra.gmra.mxu0 %vm776_vm8, %v774_v15 }
 0x411   :  { %947 = vmatpush1.msra.mxu0 %v925_v16 }
 0x412   :  { %948 = vmatprep.subr.mxu0 %v1639_v12 }
 0x413   :  { %949 = vmatpush1.msra.mxu0 %v924_v18 }
 0x414   :  { %950 = vmatprep.subr.mxu0 %v1639_v12 }
 0x415   :  { %951 = vmatpush1.msra.mxu0 %v923_v19  ;;  %v1068_v19 = vld [vmem:[%s2248_s10 + $0x70] sm:$0xff] }
 0x416   :  { %952 = vmatprep.subr.mxu0 %v1639_v12  ;;  %1471 = vmatpush3.msra.mxu1 %v1068_v19 }
 0x417   :  { %953 = vmatpush1.msra.mxu0 %v922_v20  ;;  %v1067_v20 = vld [vmem:[%s2248_s10 + $0x68] sm:$0xff]  ;;  %1472 = vmatprep.subr.mxu1 %v1639_v12 }
 0x418   :  { %954 = vmatprep.subr.mxu0 %v1639_v12  ;;  %1473 = vmatpush3.msra.mxu1 %v1067_v20 }
 0x419   :  { %955 = vmatpush1.msra.mxu0 %v921_v22  ;;  %1474 = vmatprep.subr.mxu1 %v1639_v12  ;;  %v1066_v22 = vld [vmem:[%s2248_s10 + $0x60] sm:$0xff] }
 0x41a   :  { %956 = vmatprep.subr.mxu0 %v1639_v12  ;;  %1475 = vmatpush3.msra.mxu1 %v1066_v22 }
 0x41b   :  { %957 = vmatpush1.msra.mxu0 %v920_v25  ;;  %v1065_v25 = vld [vmem:[%s2248_s10 + $0x58] sm:$0xff]  ;;  %1476 = vmatprep.subr.mxu1 %v1639_v12 }
 0x41c   :  { %958 = vmatprep.subr.mxu0 %v1639_v12  ;;  %1477 = vmatpush3.msra.mxu1 %v1065_v25 }
 0x41d   :  { %959 = vmatpush1.msra.mxu0 %v919_v26  ;;  %1478 = vmatprep.subr.mxu1 %v1639_v12  ;;  %v1064_v26 = vld [vmem:[%s2248_s10 + $0x50] sm:$0xff] }
 0x41e   :  { %960 = vmatprep.subr.mxu0 %v1639_v12  ;;  %1479 = vmatpush3.msra.mxu1 %v1064_v26 }
 0x41f   :  { %961 = vmatpush1.msra.mxu0 %v918_v21  ;;  %v1063_v21 = vld [vmem:[%s2248_s10 + $0x48] sm:$0xff]  ;;  %1480 = vmatprep.subr.mxu1 %v1639_v12 }
 0x420   :  { %962 = vmatprep.subr.mxu0 %v1639_v12  ;;  %1481 = vmatpush3.msra.mxu1 %v1063_v21 }
 0x421   :  { %963 = vmatpush1.msra.mxu0 %v917_v27  ;;  %1482 = vmatprep.subr.mxu1 %v1639_v12  ;;  %v1062_v27 = vld [vmem:[%s2248_s10 + $0x40] sm:$0xff] }
 0x422   :  { %964 = vmatprep.subr.mxu0 %v1639_v12  ;;  %1483 = vmatpush3.msra.mxu1 %v1062_v27 }
 0x423   :  { %965 = vmatpush1.msra.mxu0 %v916_v30  ;;  %1484 = vmatprep.subr.mxu1 %v1639_v12  ;;  %v1061_v30 = vld [vmem:[%s2248_s10 + $0x38] sm:$0xff] }
 0x424   :  { %966 = vmatprep.subr.mxu0 %v1639_v12  ;;  %1485 = vmatpush3.msra.mxu1 %v1061_v30 }
 0x425   :  { %967 = vmatpush1.msra.mxu0 %v915_v32  ;;  %1486 = vmatprep.subr.mxu1 %v1639_v12  ;;  %v1060_v32 = vld [vmem:[%s2248_s10 + $0x30] sm:$0xff] }
 0x426   :  { %968 = vmatprep.subr.mxu0 %v1639_v12  ;;  %1487 = vmatpush3.msra.mxu1 %v1060_v32 }
 0x427   :  { %969 = vmatpush1.msra.mxu0 %v914_v34  ;;  %1488 = vmatprep.subr.mxu1 %v1639_v12  ;;  %v1059_v34 = vld [vmem:[%s2248_s10 + $0x28] sm:$0xff] }
 0x428   :  { %970 = vmatprep.subr.mxu0 %v1639_v12  ;;  %1489 = vmatpush3.msra.mxu1 %v1059_v34 }
 0x429   :  { %971 = vmatpush1.msra.mxu0 %v913_v35  ;;  %1490 = vmatprep.subr.mxu1 %v1639_v12  ;;  %v1058_v35 = vld [vmem:[%s2248_s10 + $0x20] sm:$0xff] }
 0x42a   :  { %972 = vmatprep.subr.mxu0 %v1639_v12  ;;  %1491 = vmatpush3.msra.mxu1 %v1058_v35 }
 0x42b   :  { %973 = vmatpush1.msra.mxu0 %v912_v36  ;;  %v1057_v36 = vld [vmem:[%s2248_s10 + $0x18] sm:$0xff]  ;;  %1492 = vmatprep.subr.mxu1 %v1639_v12 }
 0x42c   :  { %974 = vmatprep.subr.mxu0 %v1639_v12  ;;  %1493 = vmatpush3.msra.mxu1 %v1057_v36 }
 0x42d   :  { %975 = vmatpush1.msra.mxu0 %v911_v37  ;;  %v1056_v37 = vld [vmem:[%s2248_s10 + $0x10] sm:$0xff]  ;;  %1494 = vmatprep.subr.mxu1 %v1639_v12 }
 0x42e   :  { %976 = vmatprep.subr.mxu0 %v1639_v12  ;;  %1495 = vmatpush3.msra.mxu1 %v1056_v37 }
 0x42f   :  { %977 = vmatpush1.msra.mxu0 %v910_v17  ;;  %v1055_v17 = vld [vmem:[%s2248_s10 + $0x8] sm:$0xff]  ;;  %1496 = vmatprep.subr.mxu1 %v1639_v12 }
 0x430   :  { %994 = vmatprep.subr.mxu0 %v1639_v12  ;;  %1497 = vmatpush3.msra.mxu1 %v1055_v17 }
 0x431   :  { %995 = vmatpush2.msra.mxu0 %v933_v28  ;;  %v1054_v28 = vld [vmem:[%s2248_s10] sm:$0xff]  ;;  %1498 = vmatprep.subr.mxu1 %v1639_v12 }
 0x432   :  { %996 = vmatprep.subr.mxu0 %v1639_v12  ;;  %1499 = vmatpush3.msra.mxu1 %v1054_v28 }
 0x433   :  { %997 = vmatpush2.msra.mxu0 %v932_v40  ;;  %1503 = vmatprep.subr.mxu1 %v1639_v12 }
 0x434   :  { %998 = vmatprep.subr.mxu0 %v1639_v12 }
 0x435   :  { %999 = vmatpush2.msra.mxu0 %v931_v41 }
 0x436   :  { %1000 = vmatprep.subr.mxu0 %v1639_v12 }
 0x437   :  { %1001 = vmatpush2.msra.mxu0 %v930_v42 }
 0x438   :  { %1002 = vmatprep.subr.mxu0 %v1639_v12 }
 0x439   :  { %1003 = vmatpush2.msra.mxu0 %v929_v43 }
 0x43a   :  { %1004 = vmatprep.subr.mxu0 %v1639_v12 }
 0x43b   :  { %1005 = vmatpush2.msra.mxu0 %v928_v44 }
 0x43c   :  { %1006 = vmatprep.subr.mxu0 %v1639_v12 }
 0x43d   :  { %1007 = vmatpush2.msra.mxu0 %v927_v45 }
 0x43e   :  { %1008 = vmatprep.subr.mxu0 %v1639_v12 }
 0x43f   :  { %1009 = vmatpush2.msra.mxu0 %v926_v56 }
 0x4d0   :  { %v850_v50 = vpop.f32.mrf.mxu0 }
 0x4d1   :  { %v857_v51 = vrot.slane %v850_v50, %v856_v48  ;;  %v865_v52 = vrot.slane %v850_v50, %v864_v49 }
 0x4d2   :  { %v1467_v53 = vpop.f32.mrf.mxu0 }
 0x4d3   :  { %v858_v31 = vmul.f32 %v857_v51, %v1992_v24  ;;  %v859_v54 = vmul.f32 %v857_v51, %v1990_v23  ;;  %v860_v55 = vmul.f32 %v857_v51, %v2003_v38  ;;  %v861_v29 = vmul.f32 %v857_v51, %v2005_v39 }
 0x4d5   :  { %v866_v57 = vadd.f32 %v865_v52, %v858_v31  ;;  %v867_v58 = vadd.f32 %v865_v52, %v859_v54  ;;  %v868_v59 = vadd.f32 %v865_v52, %v860_v55  ;;  %v869_v60 = vadd.f32 %v865_v52, %v861_v29 }
 0x4d7   :  { %v870_v61 = vmax.f32 %v866_v57, 0.0  ;;  %v871_v62 = vmax.f32 %v867_v58, 0.0  ;;  %v872_v63 = vmax.f32 %v868_v59, 0.0  ;;  %v873_v33 = vmax.f32 %v869_v60, 0.0 }
 0x4d9   :  { %874 = vst.msk [vmem:[#allocation3 + $0x1] sm:$0xff] %vm404_vm4, %v870_v61  ;;  %875 = vst.msk [vmem:[#allocation3 + $0x9] sm:$0xff] %vm404_vm4, %v871_v62 }
 0x4da   :  { %876 = vst.msk [vmem:[#allocation3 + $0x19] sm:$0xff] %vm404_vm4, %v872_v63  ;;  %877 = vst.msk [vmem:[#allocation3 + $0x21] sm:$0xff] %vm404_vm4, %v873_v33 }
 0x4e0   :  { %v883_v23 = vld [vmem:[#allocation3 + $0x9] sm:$0xff]  ;;  %v882_v38 = vld [vmem:[#allocation3 + $0x1] sm:$0xff] }
 0x4e1   :  { %v886_v24 = vld [vmem:[#allocation3 + $0x2] sm:$0xff]  ;;  %896 = vrot.lane.b32.xlu1 %v883_v23, %s1640_s6  ;;  %894 = vrot.lane.b32.xlu0 %v882_v38, %s1640_s6  ;;  %v884_v1 = vld [vmem:[#allocation3 + $0x19] sm:$0xff]  ;;  %v887_v6 = vld [vmem:[#allocation3 + $0xa] sm:$0xff] }
 0x4e2   :  { %1274 = vmatprep.mubr.msk.f32.mxu0 %vm404_vm4, %v886_v24  ;;  %v885_v39 = vld [vmem:[#allocation3 + $0x21] sm:$0xff]  ;;  %v880_v11 = vld [vmem:[#allocation3 + $0x18] sm:$0xff] }
 0x4e3   :  { %v878_v3 = vld [vmem:[#allocation3] sm:$0xff]  ;;  %v879_v7 = vld [vmem:[#allocation3 + $0x8] sm:$0xff] }
 0x4e4   :  { %v888_v10 = vld [vmem:[#allocation3 + $0x1a] sm:$0xff]  ;;  %v889_v15 = vld [vmem:[#allocation3 + $0x22] sm:$0xff] }
 0x4e5   :  { %900 = vrot.lane.b32.xlu1 %v885_v39, %s1640_s6  ;;  %898 = vrot.lane.b32.xlu0 %v884_v1, %s1640_s6  ;;  %v881_v16 = vld [vmem:[#allocation3 + $0x20] sm:$0xff] }
 0x553   :  { %v895_v2 = vpop.permute.xlu0 %894  ;;  %v897_v5 = vpop.permute.xlu1 %896 }
 0x554   :  { %v906_v4 = vsel %vm404_vm4, %v878_v3, %v895_v2  ;;  %v907_v8 = vsel %vm404_vm4, %v879_v7, %v897_v5  ;;  %v1159_v3 = vld [vmem:[#allocation11] sm:$0xff] }
 0x555   :  { %1011 = vmatmul.mubr.f32.vlgmr.msra.gmra.mxu0 %v906_v4 }
 0x556   :  { %1275 = vmatprep.mubr.msk.f32.mxu0 %vm404_vm4, %v887_v6 }
 0x557   :  { %v899_v9 = vpop.permute.xlu0 %898  ;;  %v901_v14 = vpop.permute.xlu1 %900 }
 0x558   :  { %v908_v13 = vsel %vm404_vm4, %v880_v11, %v899_v9  ;;  %v909_v18 = vsel %vm404_vm4, %v881_v16, %v901_v14  ;;  %v1145_v11 = vld [vmem:[#allocation9] sm:$0x1] }
 0x559   :  { %1016 = vmatmul.mubr.f32.gmra.mxu0 %v907_v8 }
 0x55a   :  { %1276 = vmatprep.mubr.msk.f32.mxu0 %vm404_vm4, %v888_v10 }
 0x55d   :  { %1021 = vmatmul.mubr.f32.gmra.mxu0 %v908_v13 }
 0x55e   :  { %1277 = vmatprep.mubr.msk.f32.mxu0 %vm404_vm4, %v889_v15  ;;  %v1152_v15 = vld [vmem:[#allocation9 + $0x1] sm:$0x1] }
 0x561   :  { %1026 = vmatmul.mubr.f32.gmra.mxu0 %v909_v18 }
 0x615   :  { %v1012_v40 = vpop.f32.mrf.mxu0 }
 0x616   :  { %v1040_v46 = vmul.f32 %v1012_v40, %v1012_v40 }
 0x617   :  { %v1014_v41 = vpop.f32.mrf.mxu0 }
 0x619   :  { %v1017_v42 = vpop.f32.mrf.mxu0 }
 0x61a   :  { %v1041_v44 = vmul.f32 %v1017_v42, %v1017_v42  ;;  %v1031_v50 = vadd.f32 %v1017_v42, %v1012_v40 }
 0x61b   :  { %v1019_v43 = vpop.f32.mrf.mxu0 }
 0x61c   :  { %v1044_v53 = vadd.f32 %v1041_v44, %v1040_v46 }
 0x61d   :  { %v1022_v45 = vpop.f32.mrf.mxu0 }
 0x61e   :  { %v1042_v51 = vmul.f32 %v1022_v45, %v1022_v45  ;;  %v1032_v31 = vadd.f32 %v1031_v50, %v1022_v45 }
 0x61f   :  { %v1024_v52 = vpop.f32.mrf.mxu0 }
 0x620   :  { %v1045_v55 = vadd.f32 %v1044_v53, %v1042_v51 }
 0x621   :  { %v1027_v54 = vpop.f32.mrf.mxu0 }
 0x622   :  { %v1033_v29 = vadd.f32 %v1032_v31, %v1027_v54  ;;  %v1043_v56 = vmul.f32 %v1027_v54, %v1027_v54 }
 0x623   :  { %v1029_v57 = vpop.f32.mrf.mxu0 }
 0x624   :  { %v1034_v58 = vrot.slane %v1033_v29, 4  ;;  %v1046_v59 = vadd.f32 %v1045_v55, %v1043_v56 }
 0x626   :  { %v1035_v60 = vadd.f32 %v1034_v58, %v1033_v29  ;;  %v1047_v61 = vrot.slane %v1046_v59, 4 }
 0x628   :  { %v1036_v62 = vrot.slane %v1035_v60, 2  ;;  %v1048_v63 = vadd.f32 %v1047_v61, %v1046_v59 }
 0x62a   :  { %v1037_v33 = vadd.f32 %v1036_v62, %v1035_v60  ;;  %v1049_v23 = vrot.slane %v1048_v63, 2 }
 0x62c   :  { %v1038_v24 = vrot.slane %v1037_v33, 1  ;;  %v1050_v38 = vadd.f32 %v1049_v23, %v1048_v63 }
 0x62e   :  { %v1051_v39 = vrot.slane %v1050_v38, 1  ;;  %v1039_v0 = vadd.f32 %v1038_v24, %v1037_v33 }
 0x630   :  { %v1052_v1 = vadd.f32 %v1051_v39, %v1050_v38 }
 0x632   :  { %v1053_v2 = vsel %vm673_vm6, %v1039_v0, %v1052_v1 }
 0x633   :  { %1501 = vmatmul.mubr.f32.vlgmr.msra.gmra.mxu1 %v1053_v2 }
 0x634   :  { %1505 = vmatprep.mubr.msk.f32.mxu1 %vm1641_vm5, %v1639_v12  ;;  %1504 = vmatpush3.msra.mxu1 %v1159_v3 }
 0x6f3   :  { %v1136_v4 = vpop.f32.mrf.mxu1 }
 0x6f4   :  { %v1140_v5 = vmul.f32 %v1136_v4, %v1136_v4 }
 0x6f5   :  { %v1502_v6 = vpop.f32.mrf.mxu1 }
 0x6f6   :  { %v1142_v7 = vrot.slane %v1140_v5, 7 }
 0x6f8   :  { %v1144_v8 = vsub.f32 %v1136_v4, %v1142_v7 }
 0x6fa   :  { %v1146_v9 = vadd.f32 1e-05, %v1144_v8 }
 0x6fc   :  { %1522 = vrsqrt.f32 %v1146_v9 }
 0x709   :  { %v1523_v10 = vpop.eup %1522 }
 0x70a   :  { %v1149_v13 = vrot.slane %v1523_v10, 1 }
 0x70c   :  { %v1151_v14 = vmul.f32 %v1149_v13, %v1145_v11 }
 0x70e   :  { %v1153_v16 = vmul.f32 %v1151_v14, %v1136_v4 }
 0x710   :  { %v1154_v18 = vsub.f32 %v1152_v15, %v1153_v16 }
 0x712   :  { %v1156_v19 = vrot.slane %v1154_v18, 7 }
 0x714   :  { %v1158_v12 = vsel %vm673_vm6, %v1151_v14, %v1156_v19 }
 0x715   :  { %1506 = vmatmul.mubr.msk.f32.vlgmr.msra.gmra.mxu1 %vm1160_vm10, %v1158_v12 }
 0x7d5   :  { %v1230_v20 = vpop.f32.mrf.mxu1 }
 0x7d6   :  { %v1237_v22 = vrot.slane %v1230_v20, %v856_v48  ;;  %v1245_v25 = vrot.slane %v1230_v20, %v864_v49 }
 0x7d7   :  { %v1507_v26 = vpop.f32.mrf.mxu1 }
 0x7d8   :  { %v1238_v21 = vmul.f32 %v1237_v22, %v1012_v40  ;;  %v1239_v27 = vmul.f32 %v1237_v22, %v1017_v42  ;;  %v1240_v30 = vmul.f32 %v1237_v22, %v1022_v45  ;;  %v1241_v32 = vmul.f32 %v1237_v22, %v1027_v54 }
 0x7da   :  { %v1246_v34 = vadd.f32 %v1245_v25, %v1238_v21  ;;  %v1247_v35 = vadd.f32 %v1245_v25, %v1239_v27  ;;  %v1248_v36 = vadd.f32 %v1245_v25, %v1240_v30  ;;  %v1249_v37 = vadd.f32 %v1245_v25, %v1241_v32 }
 0x7dc   :  { %v1250_v17 = vmax.f32 %v1246_v34, 0.0  ;;  %v1251_v28 = vmax.f32 %v1247_v35, 0.0  ;;  %v1252_v41 = vmax.f32 %v1248_v36, 0.0  ;;  %v1253_v43 = vmax.f32 %v1249_v37, 0.0 }
 0x7de   :  { %1254 = vst [vmem:[%s2250_s12] sm:$0xff] %v1250_v17  ;;  %1255 = vst [vmem:[%s2250_s12 + $0x8] sm:$0xff] %v1251_v28 }
 0x7df   :  { %1256 = vst [vmem:[%s2250_s12 + $0x10] sm:$0xff] %v1252_v41  ;;  %1257 = vst [vmem:[%s2250_s12 + $0x18] sm:$0xff] %v1253_v43 }
 0x7e0   :  { %1262 = vsyncpa [#allocation5], 1 }
 0x7e1   :  { %1263 = vsyncpa [#allocation7], 1 }
 0x7e2   :  { %1264 = vsyncpa [#allocation10], 1 }

</bundles_post_ra>
